<compile_context>
chip_gen: v7x
topology: tpu7x:2x2x1
jax: 0.10.0
libtpu: 0.0.40
codegen_flags: <defaults>
</compile_context>

<pallas_src>
import jax
import jax.numpy as jnp
import numpy as np
from jax.experimental import pallas as pl
from jax.experimental.pallas import tpu as pltpu


def unrolled_kernel(eta_ref, x_ref, y_ref, at_ref, a_ref, out_ref):
    # eta_ref: SMEM (1,), x_ref: (TB, N), y_ref: (TB, M),
    # at_ref: (N, M) resident A^T, a_ref: (M, N) resident A.
    eta = eta_ref[0]
    x = x_ref[...]

    # res = x @ A^T - y  -> (TB, M): standard (TB,N)x(N,M) MXU matmul,
    # no in-kernel transpose of A.
    res = jnp.dot(x, at_ref[...], preferred_element_type=jnp.float32) - y_ref[...]

    # out = x - (eta * res) @ A -> (TB, N); eta scales the smaller (TB, M)
    # intermediate and everything stays in vregs.
    out_ref[...] = (
        x - jnp.dot(eta * res, a_ref[...], preferred_element_type=jnp.float32)
    ).astype(out_ref.dtype)


def _vmem_capacity_bytes():
    """Per-core VMEM capacity, queried from hardware when available."""
    try:
        info = pltpu.get_tpu_info()
        for name in ("vmem_capacity_bytes", "vmem_size_bytes", "vmem_bytes"):
            v = getattr(info, name, None)
            if v:
                return int(v)
    except Exception:
        pass
    return 64 << 20  # conservative default: v7x per-TensorCore VMEM


def _pick_batch_tile(B, N, M, itemsize, a_itemsize, budget):
    """Largest batch tile (multiple of 8, divides B, <= B//2 when possible)
    whose double-buffered x/y/out footprint plus resident A/A^T fits budget."""
    if B <= 8:
        return B
    resident = 4 * M * N * a_itemsize           # A + A^T (worst case 2 bufs each)
    avail = max(budget - resident, 1 << 20)
    per_row = (2 * N + M) * itemsize            # x tile + out tile + y tile
    fit = avail // (2 * per_row)                # double-buffered pipeline
    cap = max(8, B // 2)                        # >= 2 grid steps (v7x megacore)
    tb = int(min(fit, cap, 2048))
    tb = max(8, (tb // 8) * 8)
    while tb > 8 and B % tb != 0:
        tb -= 8
    if B % tb != 0:
        # B not a multiple of 8: one full-batch block (block == full dim is legal).
        tb = B
    return tb


def _reference_jnp(x, y, A, eta_c):
    # Fused-XLA fallback for tiny / lane-ragged shapes.
    return x - (eta_c * (x @ A.T - y)) @ A


def unrolled_layer(x, y, A, eta, *, tb=None, force_pallas=False):
    """Pallas implementation of UnrolledLayer.forward.

    x: (B, N) float32, y: (B, M) float32, A: (M, N) float32, eta: (1,) float32
    returns: (B, N) float32
    """
    B, N = x.shape
    M, N2 = A.shape
    assert N2 == N and y.shape == (B, M)

    eta_c = jnp.clip(eta, 0.0, 100.0).astype(jnp.float32).reshape((1,))

    cap = _vmem_capacity_bytes()
    budget = max(cap - (16 << 20), 8 << 20)     # leave headroom for the compiler
    itemsize = jnp.dtype(x.dtype).itemsize
    a_itemsize = jnp.dtype(A.dtype).itemsize
    a_resident = 4 * M * N * a_itemsize

    lane_dense = (N % 128 == 0) and (M % 128 == 0)
    big_enough = (B >= 16) and (B % 8 == 0)
    if not force_pallas and not (lane_dense and big_enough and a_resident <= budget):
        # Tiny or lane-ragged shapes: masked stores + underfilled MXU mean the
        # Pallas kernel is pure overhead — let XLA fuse it.
        return _reference_jnp(x, y, A, eta_c)

    if tb is None:
        tb = _pick_batch_tile(B, N, M, itemsize, a_itemsize, budget)
    grid = (B // tb,)

    # VMEM request: resident A + A^T (conservatively assume 2 buffers each)
    # plus double-buffered x / y / out batch tiles, with a little slack.
    need = a_resident + 2 * (2 * tb * N + tb * M) * itemsize
    vmem_limit = int(min(max(need + (2 << 20), 32 << 20), cap - (8 << 20)))

    out_shape = jax.ShapeDtypeStruct((B, N), x.dtype)

    def build(single_buffer_a):
        a_kwargs = {}
        if single_buffer_a and hasattr(pl, "Buffered"):
            a_kwargs = dict(pipeline_mode=pl.Buffered(1))
        return pl.pallas_call(
            unrolled_kernel,
            out_shape=out_shape,
            grid=grid,
            in_specs=[
                pl.BlockSpec(memory_space=pltpu.SMEM),               # eta scalar
                pl.BlockSpec((tb, N), lambda i: (i, 0)),             # x tile
                pl.BlockSpec((tb, M), lambda i: (i, 0)),             # y tile
                pl.BlockSpec((N, M), lambda i: (0, 0), **a_kwargs),  # A^T resident
                pl.BlockSpec((M, N), lambda i: (0, 0), **a_kwargs),  # A resident
            ],
            out_specs=pl.BlockSpec((tb, N), lambda i: (i, 0)),
            compiler_params=pltpu.CompilerParams(
                dimension_semantics=("parallel",),   # megacore-shard the batch
                vmem_limit_bytes=vmem_limit,
            ),
        )

    A_T = A.T  # one-time transpose in the wrapper; resident across the grid
    try:
        out = build(True)(eta_c, x, y, A_T, A)
        return jax.block_until_ready(out)
    except Exception:
        # pipeline_mode=Buffered(1) unsupported in this build: identical
        # semantics with default double-buffered residency for A / A^T.
        return build(False)(eta_c, x, y, A_T, A)


def _host_reference(x, y, A, eta):
    """float64 numpy reference mirroring the PyTorch code (with permutes)."""
    x64 = np.asarray(x, dtype=np.float64)
    y64 = np.asarray(y, dtype=np.float64)
    A64 = np.asarray(A, dtype=np.float64)
    eta_c = np.clip(np.asarray(eta, dtype=np.float64), 0.0, 100.0)
    xT = x64.T                       # (N, B)
    res = A64 @ xT - y64.T           # (M, B)
    return (xT - eta_c * (A64.T @ res)).T   # (B, N)


if __name__ == "__main__":
    # Deterministic parameters / inputs (synthetic, no checkpoint load).
    key = jax.random.PRNGKey(0)
    k_a, k_eta, k_x, k_y = jax.random.split(key, 4)

    # Lane-dense, MXU-friendly (but still small) shapes -> Pallas path,
    # 2 parallel grid steps over the batch.
    B, N, M = 128, 256, 128
    A = jax.random.normal(k_a, (M, N), dtype=jnp.float32)
    eta = jax.random.uniform(k_eta, (1,), dtype=jnp.float32)   # torch.rand(1)
    x = jax.random.normal(k_x, (B, N), dtype=jnp.float32)
    y = jax.random.normal(k_y, (B, M), dtype=jnp.float32)

    out = jax.block_until_ready(unrolled_layer(x, y, A, eta))
    ref = _host_reference(x, y, A, eta)
    # Tolerance sized for f32 MXU accumulation-order differences vs f64 host.
    np.testing.assert_allclose(np.asarray(out), ref, rtol=5e-3, atol=5e-3)

    # Tiny, lane-ragged shape exercises the fused-XLA fallback path.
    Bs, Ns, Ms = 8, 32, 16
    As = jax.random.normal(k_a, (Ms, Ns), dtype=jnp.float32)
    xs = jax.random.normal(k_x, (Bs, Ns), dtype=jnp.float32)
    ys = jax.random.normal(k_y, (Bs, Ms), dtype=jnp.float32)
    outs = jax.block_until_ready(unrolled_layer(xs, ys, As, eta))
    np.testing.assert_allclose(np.asarray(outs), _host_reference(xs, ys, As, eta),
                               rtol=5e-3, atol=5e-3)

    print("KERNEL_OK")
</pallas_src>

<mosaic_0001>
module attributes {stable_mosaic.version = 11 : i64} {
  func.func @unrolled_kernel(%arg0: i32, %arg1: memref<1xf32, #tpu.memory_space<smem>>, %arg2: memref<64x256xf32, #tpu.memory_space<vmem>>, %arg3: memref<64x128xf32, #tpu.memory_space<vmem>>, %arg4: memref<256x128xf32, #tpu.memory_space<vmem>>, %arg5: memref<128x256xf32, #tpu.memory_space<vmem>>, %arg6: memref<64x256xf32, #tpu.memory_space<vmem>>) attributes {dimension_semantics = [#tpu.dimension_semantics<parallel>], iteration_bounds = array<i64: 2>, scalar_prefetch = 0 : i64, scratch_operands = 0 : i64, tpu.core_type = #tpu.core_type<tc>, window_params = [{transform_indices = @transform_0, window_bounds = array<i64: 1>}, {transform_indices = @transform_1, window_bounds = array<i64: 64, 256>}, {transform_indices = @transform_2, window_bounds = array<i64: 64, 128>}, {pipeline_mode = #tpu.pipeline_mode<synchronous>, transform_indices = @transform_3, window_bounds = array<i64: 256, 128>}, {pipeline_mode = #tpu.pipeline_mode<synchronous>, transform_indices = @transform_4, window_bounds = array<i64: 128, 256>}, {transform_indices = @transform_5, window_bounds = array<i64: 64, 256>}]} {
    %c0 = arith.constant 0 : index
    %0 = memref.load %arg1[%c0] : memref<1xf32, #tpu.memory_space<smem>>
    %c0_0 = arith.constant 0 : index
    %c0_1 = arith.constant 0 : index
    %1 = vector.load %arg2[%c0_0, %c0_1] : memref<64x256xf32, #tpu.memory_space<vmem>>, vector<64x256xf32>
    %c0_2 = arith.constant 0 : index
    %c0_3 = arith.constant 0 : index
    %2 = vector.load %arg4[%c0_2, %c0_3] : memref<256x128xf32, #tpu.memory_space<vmem>>, vector<256x128xf32>
    %cst = arith.constant dense<0.000000e+00> : vector<64x128xf32>
    %3 = tpu.matmul %1, %2, %cst {dimension_numbers = #tpu.dot_dimension_numbers<[1], [0], [0], [1], [0, 0, 1, 1], [], []>} : vector<64x256xf32>, vector<256x128xf32>, vector<64x128xf32> -> vector<64x128xf32>
    %c0_4 = arith.constant 0 : index
    %c0_5 = arith.constant 0 : index
    %4 = vector.load %arg3[%c0_4, %c0_5] : memref<64x128xf32, #tpu.memory_space<vmem>>, vector<64x128xf32>
    %5 = arith.subf %3, %4 : vector<64x128xf32>
    %6 = vector.broadcast %0 : f32 to vector<64x128xf32>
    %7 = arith.mulf %6, %5 : vector<64x128xf32>
    %c0_6 = arith.constant 0 : index
    %c0_7 = arith.constant 0 : index
    %8 = vector.load %arg5[%c0_6, %c0_7] : memref<128x256xf32, #tpu.memory_space<vmem>>, vector<128x256xf32>
    %cst_8 = arith.constant dense<0.000000e+00> : vector<64x256xf32>
    %9 = tpu.matmul %7, %8, %cst_8 {dimension_numbers = #tpu.dot_dimension_numbers<[1], [0], [0], [1], [0, 0, 1, 1], [], []>} : vector<64x128xf32>, vector<128x256xf32>, vector<64x256xf32> -> vector<64x256xf32>
    %10 = arith.subf %1, %9 : vector<64x256xf32>
    %c0_9 = arith.constant 0 : index
    %c0_10 = arith.constant 0 : index
    %11 = vector.load %arg6[%c0_9, %c0_10] : memref<64x256xf32, #tpu.memory_space<vmem>>, vector<64x256xf32>
    tpu.vector_store %arg6[%c0_9, %c0_10], %10 {strides = array<i32>} : memref<64x256xf32, #tpu.memory_space<vmem>>, vector<64x256xf32>,
    return
  }
  func.func @transform_0(%arg0: i32) -> i32 {
    %c0_i32 = arith.constant 0 : i32
    %c0_i32_0 = arith.constant 0 : i32
    return %c0_i32 : i32
  }
  func.func @transform_1(%arg0: i32) -> (i32, i32) {
    %c0_i32 = arith.constant 0 : i32
    %c0_i32_0 = arith.constant 0 : i32
    return %arg0, %c0_i32 : i32, i32
  }
  func.func @transform_2(%arg0: i32) -> (i32, i32) {
    %c0_i32 = arith.constant 0 : i32
    %c0_i32_0 = arith.constant 0 : i32
    return %arg0, %c0_i32 : i32, i32
  }
  func.func @transform_3(%arg0: i32) -> (i32, i32) {
    %c0_i32 = arith.constant 0 : i32
    %c0_i32_0 = arith.constant 0 : i32
    %c0_i32_1 = arith.constant 0 : i32
    return %c0_i32, %c0_i32_0 : i32, i32
  }
  func.func @transform_4(%arg0: i32) -> (i32, i32) {
    %c0_i32 = arith.constant 0 : i32
    %c0_i32_0 = arith.constant 0 : i32
    %c0_i32_1 = arith.constant 0 : i32
    return %c0_i32, %c0_i32_0 : i32, i32
  }
  func.func @transform_5(%arg0: i32) -> (i32, i32) {
    %c0_i32 = arith.constant 0 : i32
    %c0_i32_0 = arith.constant 0 : i32
    return %arg0, %c0_i32 : i32, i32
  }
}

module attributes {stable_mosaic.version = 11 : i64} {
  func.func @unrolled_kernel(%arg0: i32, %arg1: memref<1xf32, #tpu.memory_space<smem>>, %arg2: memref<64x256xf32, #tpu.memory_space<vmem>>, %arg3: memref<64x128xf32, #tpu.memory_space<vmem>>, %arg4: memref<256x128xf32, #tpu.memory_space<vmem>>, %arg5: memref<128x256xf32, #tpu.memory_space<vmem>>, %arg6: memref<64x256xf32, #tpu.memory_space<vmem>>) attributes {dimension_semantics = [#tpu.dimension_semantics<parallel>], iteration_bounds = array<i64: 2>, scalar_prefetch = 0 : i64, scratch_operands = 0 : i64, tpu.core_type = #tpu.core_type<tc>, window_params = [{transform_indices = @transform_0, window_bounds = array<i64: 1>}, {transform_indices = @transform_1, window_bounds = array<i64: 64, 256>}, {transform_indices = @transform_2, window_bounds = array<i64: 64, 128>}, {pipeline_mode = #tpu.pipeline_mode<synchronous>, transform_indices = @transform_3, window_bounds = array<i64: 256, 128>}, {pipeline_mode = #tpu.pipeline_mode<synchronous>, transform_indices = @transform_4, window_bounds = array<i64: 128, 256>}, {transform_indices = @transform_5, window_bounds = array<i64: 64, 256>}]} {
    %c0 = arith.constant 0 : index
    %0 = memref.load %arg1[%c0] : memref<1xf32, #tpu.memory_space<smem>>
    %c0_0 = arith.constant 0 : index
    %c0_1 = arith.constant 0 : index
    %1 = vector.load %arg2[%c0_0, %c0_1] : memref<64x256xf32, #tpu.memory_space<vmem>>, vector<64x256xf32>
    %c0_2 = arith.constant 0 : index
    %c0_3 = arith.constant 0 : index
    %2 = vector.load %arg4[%c0_2, %c0_3] : memref<256x128xf32, #tpu.memory_space<vmem>>, vector<256x128xf32>
    %cst = arith.constant dense<0.000000e+00> : vector<64x128xf32>
    %3 = tpu.matmul %1, %2, %cst {dimension_numbers = #tpu.dot_dimension_numbers<[1], [0], [0], [1], [0, 0, 1, 1], [], []>} : vector<64x256xf32>, vector<256x128xf32>, vector<64x128xf32> -> vector<64x128xf32>
    %c0_4 = arith.constant 0 : index
    %c0_5 = arith.constant 0 : index
    %4 = vector.load %arg3[%c0_4, %c0_5] : memref<64x128xf32, #tpu.memory_space<vmem>>, vector<64x128xf32>
    %5 = arith.subf %3, %4 : vector<64x128xf32>
    %6 = vector.broadcast %0 : f32 to vector<64x128xf32>
    %7 = arith.mulf %6, %5 : vector<64x128xf32>
    %c0_6 = arith.constant 0 : index
    %c0_7 = arith.constant 0 : index
    %8 = vector.load %arg5[%c0_6, %c0_7] : memref<128x256xf32, #tpu.memory_space<vmem>>, vector<128x256xf32>
    %cst_8 = arith.constant dense<0.000000e+00> : vector<64x256xf32>
    %9 = tpu.matmul %7, %8, %cst_8 {dimension_numbers = #tpu.dot_dimension_numbers<[1], [0], [0], [1], [0, 0, 1, 1], [], []>} : vector<64x128xf32>, vector<128x256xf32>, vector<64x256xf32> -> vector<64x256xf32>
    %10 = arith.subf %1, %9 : vector<64x256xf32>
    %c0_9 = arith.constant 0 : index
    %c0_10 = arith.constant 0 : index
    %11 = vector.load %arg6[%c0_9, %c0_10] : memref<64x256xf32, #tpu.memory_space<vmem>>, vector<64x256xf32>
    tpu.vector_store %arg6[%c0_9, %c0_10], %10 {strides = array<i32>} : memref<64x256xf32, #tpu.memory_space<vmem>>, vector<64x256xf32>,
    return
  }
  func.func @transform_0(%arg0: i32) -> i32 {
    %c0_i32 = arith.constant 0 : i32
    %c0_i32_0 = arith.constant 0 : i32
    return %c0_i32 : i32
  }
  func.func @transform_1(%arg0: i32) -> (i32, i32) {
    %c0_i32 = arith.constant 0 : i32
    %c0_i32_0 = arith.constant 0 : i32
    return %arg0, %c0_i32 : i32, i32
  }
  func.func @transform_2(%arg0: i32) -> (i32, i32) {
    %c0_i32 = arith.constant 0 : i32
    %c0_i32_0 = arith.constant 0 : i32
    return %arg0, %c0_i32 : i32, i32
  }
  func.func @transform_3(%arg0: i32) -> (i32, i32) {
    %c0_i32 = arith.constant 0 : i32
    %c0_i32_0 = arith.constant 0 : i32
    %c0_i32_1 = arith.constant 0 : i32
    return %c0_i32, %c0_i32_0 : i32, i32
  }
  func.func @transform_4(%arg0: i32) -> (i32, i32) {
    %c0_i32 = arith.constant 0 : i32
    %c0_i32_0 = arith.constant 0 : i32
    %c0_i32_1 = arith.constant 0 : i32
    return %c0_i32, %c0_i32_0 : i32, i32
  }
  func.func @transform_5(%arg0: i32) -> (i32, i32) {
    %c0_i32 = arith.constant 0 : i32
    %c0_i32_0 = arith.constant 0 : i32
    return %arg0, %c0_i32 : i32, i32
  }
}

</mosaic_0001>

<bundles_post_ra>
// kernel: tpu_custom_call.1
= control target key start
LH: loop header
LB: loop body
LE: loop exit
PB: predicated region body
PF: predicated region fallthrough
CT: control target
= control target key end

     0   :  { %s1694_s0 = inlined_call_operand.<no memory space> [shape: f32[1], index: 0, kind: input, shape index: {}]   ;;  %s1695_s1 = inlined_call_operand.hbm [shape: f32[128,256], index: 1, kind: input, shape index: {}]   ;;  %s1696_s2 = inlined_call_operand.hbm [shape: f32[128,128], index: 2, kind: input, shape index: {}]   ;;  %s1697_s3 = inlined_call_operand.hbm [shape: f32[256,128], index: 3, kind: input, shape index: {}]   ;;  %s1698_s4 = inlined_call_operand.hbm [shape: f32[128,256], index: 4, kind: input, shape index: {}]   ;;  %s1699_s5 = inlined_call_operand.hbm [shape: f32[128,256], index: 5, kind: output, shape index: {}]  }
   0x1   :  { %1705 = sst [smem:[#allocation17_spill]] %s1695_s1 }
   0x2   :  { %1706 = sst [smem:[#allocation18_spill]] %s1697_s3 }
   0x3   :  { %10 = sst [smem:[#allocation2]] %s1694_s0 }
   0x4   :  { %11 = vsyncpa [#allocation4], 0 }
   0x5   :  { %13 = vsyncpa [#allocation4 + $0x1], 0 }
   0x6   :  { %14 = vsyncpa [#allocation7], 0 }
   0x7   :  { %16 = vsyncpa [#allocation7 + $0x1], 0 }
   0x8   :  { %17 = vsyncpa [#allocation10], 0 }
   0x9   :  { %18 = vsyncpa [#allocation5], 0 }
   0xa   :  { %20 = vsyncpa [#allocation5 + $0x1], 0  ;;  %s1272_s20 = smov 0   ;;  %s1274_s21 = smov 0  }
   0xb   :  { %s1276_s22 = smov 0   ;;  %s1278_s23 = smov 0  }
   0xc LB: > { %s1293_s0 = sadd.s32 4294967295, %s1225_s23   ;;  %s803_s24 = sadd.s32 4294967294, %s1225_s23   ;;  %s1225_s23 = sphi %s1278_s23, %s1730_s23   ;;  %s1221_s22 = sphi %s1276_s22, %s1729_s22   ;;  %s1217_s21 = sphi %s1274_s21, %s1728_s21   ;;  %s1213_s20 = sphi %s1272_s20, %s1727_s20  }
   0xd   : > { %p67_p0 = scmp.ne.s32.totalorder %s1217_s21, %s1213_s20  ;;  %p1700_p1 = scmp.eq.s32.totalorder %s1293_s0, 0 }
   0xe   : > { %p165_p3 = scmp.eq.s32.totalorder %s803_s24, 1  ;;  %p804_p5 = scmp.ge.s32.totalorder %s1225_s23, 1 }
   0xf   : > { %p1302_p4 = por %p1700_p1, %p67_p0  ;;  %p172_p7 = scmp.lt.s32.totalorder %s1225_s23, 3 }
  0x10   : > { %p1307_p6 = por %p165_p3, %p67_p0  ;;  %s1227_s28 = smov [#allocation8]  }
  0x11   : > { %s1707_s25 = scalar_select %p1302_p4, 1, 0 }
  0x12   : > { %s1708_s26 = scalar_select %p1307_p6, 1, 0 }
  0x13   : > { %p1312_p8 = pnand %p804_p5, %p172_p7  ;;  %s187_s29 = sshll.u32 %s1227_s28, 4  ;;  %s1316_s29 = int_to_ptr.vmem [resolvable:$true] %s187_s29 }
  0x14   : > { %s1228_s6 = smov [#allocation9]   ;;  %s1711_s3 = sld [smem:[#allocation18_spill]] }
  0x15   : > { %p966_p9 = pneg %p1312_p8  ;;  %s200_s7 = sshll.u32 %s1228_s6, 4  ;;  %s1327_s7 = int_to_ptr.vmem [resolvable:$true] %s200_s7 }
  0x17   : > { %p1323_p11 = pnand %p966_p9, %p1700_p1 }
  0x19   : > { %p1033_p13 = pneg %p1323_p11 }
  0x1a   : > { %s1031_s10 = scalar_lea.hbm %s1711_s3, 4096 }
  0x1b   : > { %p1032_p12 = scmp.ne.s32.totalorder %s1711_s3, %s1031_s10  ;;  %p1038_p5 = scmp.lt.u32.totalorder %s1031_s10, %s1711_s3 }
  0x1d   : > { %p1034_p0 = pnand %p1033_p13, %p1032_p12 }
  0x1f   : > { %p1035_p3 = pneg %p1034_p0 }
  0x21   : > { %p1040_p7 = pnand %p1038_p5, %p1035_p3 }
  0x23   : > { %1043 = shalt.err (!%p1040_p7)
}
  0x24   : > { %s1044_s15 = scalar_lea.vmem %s1316_s29, 4096  ;;  %p1052_p2 = scmp.lt.s32.totalorder %s1316_s29, %s1316_s29 }
  0x25   : > { %p1045_p9 = scmp.ne.s32.totalorder %s1316_s29, %s1044_s15  ;;  %p1053_p12 = scmp.lt.s32.totalorder %s1044_s15, %s1044_s15 }
  0x27   : > { %p1047_p10 = pnand %p1045_p9, %p1033_p13  ;;  %p1054_p0 = por %p1053_p12, %p1052_p2 }
  0x29   : > { %p1048_p1 = pneg %p1047_p10 }
  0x2b   : > { %p1055_p6 = pnand %p1054_p0, %p1048_p1 }
  0x2d   : > { %1058 = shalt.err (!%p1055_p6)
}
  0x2e   : > { %s1701_s16 = smov 128   ;;  %s1702_s17 = smov 8  }
  0x2f   : > { %969 = dma.hbm_to_vmem [thread:$0]  (!%p1323_p11), %s1711_s3, 4096, %s1316_s29, [#allocation7], %s1701_s16, %s1701_s16, %s1702_s17  }
  0x30   : > { %s1059_s6 = scalar_lea.hbm %s1698_s4, 4096 }
  0x31   : > { %p1060_p1 = scmp.ne.s32.totalorder %s1698_s4, %s1059_s6  ;;  %p1066_p10 = scmp.lt.u32.totalorder %s1059_s6, %s1698_s4 }
  0x33   : > { %p1062_p2 = pnand %p1060_p1, %p1033_p13 }
  0x35   : > { %p1063_p6 = pneg %p1062_p2 }
  0x37   : > { %p1068_p3 = pnand %p1066_p10, %p1063_p6 }
  0x39   : > { %1071 = shalt.err (!%p1068_p3)
}
  0x3a   : > { %s1072_s29 = scalar_lea.vmem %s1327_s7, 4096  ;;  %p1080_p12 = scmp.lt.s32.totalorder %s1327_s7, %s1327_s7 }
  0x3b   : > { %p1073_p5 = scmp.ne.s32.totalorder %s1327_s7, %s1072_s29  ;;  %p1081_p0 = scmp.lt.s32.totalorder %s1072_s29, %s1072_s29 }
  0x3d   : > { %p1075_p7 = pnand %p1073_p5, %p1033_p13  ;;  %p1082_p1 = por %p1081_p0, %p1080_p12 }
  0x3f   : > { %p1076_p9 = pneg %p1075_p7 }
  0x41   : > { %p1083_p2 = pnand %p1082_p1, %p1076_p9 }
  0x43   : > { %1086 = shalt.err (!%p1083_p2)
}
  0x44   : > { %s1231_s12 = smov 256   ;;  %s1232_s13 = smov 16  }
  0x45   : > { %972 = dma.hbm_to_vmem [thread:$0]  (!%p1323_p11), %s1698_s4, 4096, %s1327_s7, [#allocation10], %s1231_s12, %s1231_s12, %s1232_s13  }
  0x46   : > { %s1388_s18 = sadd.s32 1, %s1225_s23   ;;  %s54_s24 = sadd.s32 1, %s1221_s22 }
  0x47   : > { %s51_s19 = ssub.s32 %s1225_s23, %s1388_s18  ;;  %p61_p6 = scmp.ne.s32.totalorder %s1221_s22, %s1217_s21 }
  0x48   : > { %p52_p13 = scmp.eq.s32.totalorder %s51_s19, 0  ;;  %p62_p10 = scmp.eq.s32.totalorder %s1225_s23, 0 }
  0x49   : > { %p1712_p5 = scmp.eq.s32.totalorder %s1293_s0, 1  ;;  %p986_p9 = scmp.lt.s32.totalorder %s1225_s23, 2 }
  0x4a   : > { %s1397_s28 = scalar_select %p52_p13, %s1221_s22, %s54_s24  }
  0x4b   : > { %p63_p3 = por %p62_p10, %p61_p6  ;;  %p1401_p7 = por %p1712_p5, %p61_p6 }
  0x4c   : > { %s1407_s6 = sand.u32 1, %s1221_s22   ;;  %s828_s8 = sshll.u32 %s1225_s23, 11 }
  0x4d   : > { %s1713_s30 = scalar_select %p1401_p7, 1, 0 }
  0x4e   : > { %s808_s7 = sshll.u32 %s1407_s6, 7  ;;  %s1714_s1 = sld [smem:[#allocation17_spill]] }
  0x4f   : > { %s218_s29 = scalar_lea.vmem [#allocation3], %s808_s7  ;;  %p1418_p11 = pnand %p986_p9, %p63_p3 }
  0x50   : > { %s226_s14 = sshll.u32 %s218_s29, 4  ;;  %s812_s24 = sshll.u32 %s1407_s6, 6  ;;  %s1416_s14 = int_to_ptr.vmem [resolvable:$true] %s226_s14 }
  0x51   : > { %s215_s16 = scalar_lea.sflag [#allocation4], %s1407_s6  ;;  %p1089_p0 = pneg %p1418_p11 }
  0x54   : > { %s1414_s11 = scalar_lea.hbm %s1714_s1, %s828_s8  ;;  %s1092_s10 = scalar_lea.hbm %s1714_s1, 4096 }
  0x55   : > { %s1087_s9 = scalar_lea.hbm %s1414_s11, 2048  ;;  %p1093_p13 = scmp.lt.u32.totalorder %s1414_s11, %s1714_s1 }
  0x56   : > { %p1088_p12 = scmp.ne.s32.totalorder %s1414_s11, %s1087_s9  ;;  %p1094_p6 = scmp.lt.u32.totalorder %s1092_s10, %s1087_s9 }
  0x57   : > { %p1096_p3 = scmp.lt.u32.totalorder %s1087_s9, %s1414_s11 }
  0x58   : > { %p1090_p1 = pnand %p1089_p0, %p1088_p12  ;;  %p1095_p10 = por %p1094_p6, %p1093_p13 }
  0x5a   : > { %p1091_p2 = pneg %p1090_p1  ;;  %p1097_p5 = por %p1096_p3, %p1095_p10 }
  0x5c   : > { %p1098_p9 = pnand %p1097_p5, %p1091_p2 }
  0x5e   : > { %1101 = shalt.err (!%p1098_p9)
}
  0x5f   : > { %s1102_s19 = scalar_lea.vmem %s1416_s14, 2048  ;;  %s1233_s7 = smov [#allocation3]  }
  0x60   : > { %p1103_p12 = scmp.ne.s32.totalorder %s1416_s14, %s1102_s19  ;;  %s1107_s8 = sshll.u32 %s1233_s7, 4  ;;  %s1108_s8 = int_to_ptr.vmem [resolvable:$false] %s1107_s8 }
  0x61   : > { %s1109_s17 = scalar_lea.vmem %s1108_s8, 4096  ;;  %p1110_p4 = scmp.lt.s32.totalorder %s1416_s14, %s1108_s8 }
  0x62   : > { %p1105_p1 = pnand %p1103_p12, %p1089_p0  ;;  %p1111_p13 = scmp.lt.s32.totalorder %s1109_s17, %s1102_s19 }
  0x64   : > { %p1106_p7 = pneg %p1105_p1  ;;  %p1112_p6 = por %p1111_p13, %p1110_p4 }
  0x66   : > { %p1113_p10 = pnand %p1112_p6, %p1106_p7 }
  0x68   : > { %1116 = shalt.err (!%p1113_p10)
}
  0x69   : > { %976 = dma.hbm_to_vmem [thread:$0]  (!%p1418_p11), %s1414_s11, 2048, %s1416_s14, %s215_s16, %s1231_s12, %s1231_s12, %s1232_s13  }
  0x6a   : > { %s829_s9 = sshll.u32 %s1225_s23, 10  ;;  %s240_s7 = scalar_lea.vmem [#allocation6], %s812_s24 }
  0x6b   : > { %s1459_s29 = scalar_lea.hbm %s1696_s2, %s829_s9  ;;  %s247_s8 = sshll.u32 %s240_s7, 4  ;;  %s1463_s8 = int_to_ptr.vmem [resolvable:$true] %s247_s8 }
  0x6c   : > { %s1716_s17 = sand.u32 1, %s1225_s23   ;;  %s1117_s3 = scalar_lea.hbm %s1459_s29, 1024 }
  0x6d   : > { %s1467_s1 = scalar_lea.sflag [#allocation7], %s1716_s17  ;;  %p1118_p4 = scmp.ne.s32.totalorder %s1459_s29, %s1117_s3 }
  0x6e   : > { %s1122_s13 = scalar_lea.hbm %s1696_s2, 2048  ;;  %p1123_p3 = scmp.lt.u32.totalorder %s1459_s29, %s1696_s2 }
  0x6f   : > { %p1120_p7 = pnand %p1118_p4, %p1089_p0  ;;  %p1124_p5 = scmp.lt.u32.totalorder %s1122_s13, %s1117_s3 }
  0x70   : > { %p1126_p12 = scmp.lt.u32.totalorder %s1117_s3, %s1459_s29 }
  0x71   : > { %p1121_p2 = pneg %p1120_p7  ;;  %p1125_p9 = por %p1124_p5, %p1123_p3 }
  0x73   : > { %p1127_p1 = por %p1126_p12, %p1125_p9 }
  0x75   : > { %p1128_p13 = pnand %p1127_p1, %p1121_p2 }
  0x77   : > { %1131 = shalt.err (!%p1128_p13)
}
  0x78   : > { %s1132_s14 = scalar_lea.vmem %s1463_s8, 1024  ;;  %s1234_s24 = smov [#allocation6]  }
  0x79   : > { %p1133_p6 = scmp.ne.s32.totalorder %s1463_s8, %s1132_s14  ;;  %s1137_s9 = sshll.u32 %s1234_s24, 4  ;;  %s1138_s9 = int_to_ptr.vmem [resolvable:$false] %s1137_s9 }
  0x7a   : > { %s1139_s10 = scalar_lea.vmem %s1138_s9, 2048  ;;  %p1140_p7 = scmp.lt.s32.totalorder %s1463_s8, %s1138_s9 }
  0x7b   : > { %p1135_p10 = pnand %p1133_p6, %p1089_p0  ;;  %p1141_p3 = scmp.lt.s32.totalorder %s1139_s10, %s1132_s14 }
  0x7d   : > { %p1136_p4 = pneg %p1135_p10  ;;  %p1142_p5 = por %p1141_p3, %p1140_p7 }
  0x7f   : > { %p1143_p9 = pnand %p1142_p5, %p1136_p4 }
  0x81   : > { %1146 = shalt.err (!%p1143_p9)
}
  0x82   : > { %s1717_s3 = smov 8   ;;  %s1718_s19 = smov 128  }
  0x83   : > { %979 = dma.hbm_to_vmem [thread:$0]  (!%p1418_p11), %s1459_s29, 1024, %s1463_s8, %s1467_s1, %s1718_s19, %s1718_s19, %s1717_s3  }
  0x84   : > { %259 = sbr.rel (%p1312_p8) target bundleno = 661 (0x295), region = 40  ;;  %s1499_s7 = sand.u32 (!%p1312_p8), 1, %s1217_s21  }
  0x85   : > { %s816_s17 = sshll.u32 (!%p1312_p8), %s1499_s7, 7  ;;  %s262_s16 = scalar_lea.sflag (!%p1312_p8), [#allocation4], %s1499_s7 }
  0x86   : > { %s1505_s15 = scalar_lea.vmem (!%p1312_p8), [#allocation3], %s816_s17  ;;  %p1719_p0 = scmp.ne.s32.totalorder (!%p1312_p8), %s1707_s25, 0 }
  0x8b   : > { %1192 = dma.done.wait (%p1719_p0), %s262_s16, 2048  }
  0x8c   : > { %1194 = vsyncadd (%p1719_p0), %s262_s16, 4294965248  ;;  %s270_s1 = sand.u32 1, %s1293_s0   ;;  %s817_s27 = sshll.u32 %s1499_s7, 6 }
  0x8d   : > { %s271_s29 = scalar_lea.sflag [#allocation7], %s270_s1  ;;  %s1513_s8 = scalar_lea.vmem [#allocation6], %s817_s27 }
  0x8e   : > { %1196 = dma.done.wait (%p1719_p0), %s271_s29, 1024  }
  0x8f   : > { %1198 = vsyncadd (%p1719_p0), %s271_s29, 4294966272  ;;  %p1720_p8 = scmp.eq.s32.totalorder %s1293_s0, 0 }
  0x91   : > { %1200 = dma.done.wait (%p1720_p8), [#allocation7], 4096   ;;  %p1721_p11 = pmov %p1720_p8 }
  0x92   : > { %p1722_p2 = pmov %p1720_p8 }
  0x93   : > { %1202 = vsyncadd (%p1721_p11), [#allocation7], 4294963200 }
  0x94   : > { %1204 = dma.done.wait (%p1722_p2), [#allocation10], 4096   ;;  %p1723_p12 = pmov %p1722_p2 }
  0x95   : > { %v350_v0 = vld [vmem:[#allocation8 + $0x80] sm:$0xff]  ;;  %v351_v1 = vld [vmem:[#allocation8 + $0x88] sm:$0xff]  ;;  %v352_v5 = vld [vmem:[#allocation8 + $0x90] sm:$0xff]  ;;  %s317_s25 = sld [smem:[#allocation2]]  ;;  %s1611_s12 = scalar_lea.vmem [#allocation11], %s816_s17 }
  0x96   : > { %1206 = vsyncadd (%p1723_p12), [#allocation10], 4294963200  ;;  %v334_v2 = vld [vmem:[#allocation8] sm:$0xff]  ;;  %v888_v3 = vpack.c.bf16 %v351_v1, %v350_v0  ;;  %v335_v4 = vld [vmem:[#allocation8 + $0x8] sm:$0xff]  ;;  %s831_s13 = sshll.u32 %s1293_s0, 11  ;;  %s688_s6 = sshll.u32 %s1611_s12, 4  ;;  %s1647_s6 = int_to_ptr.vmem [resolvable:$true] %s688_s6 }
  0x97   : > { %v353_v6 = vld [vmem:[#allocation8 + $0x98] sm:$0xff]  ;;  %v890_v7 = vpack.c.bf16 %v335_v4, %v334_v2  ;;  %v336_v9 = vld [vmem:[#allocation8 + $0x10] sm:$0xff]  ;;  %v354_v11 = vld [vmem:[#allocation8 + $0xa0] sm:$0xff]  ;;  %s1645_s24 = scalar_lea.hbm %s1699_s5, %s831_s13  ;;  %s674_s0 = scalar_lea.sflag [#allocation5], %s1499_s7 }
  0x98   : > { %v892_v8 = vpack.c.bf16 %v353_v6, %v352_v5  ;;  %v337_v10 = vld [vmem:[#allocation8 + $0x18] sm:$0xff]  ;;  %889 = vmatprep.subr.bf16.mxu0 %v888_v3  ;;  %v355_v12 = vld [vmem:[#allocation8 + $0xa8] sm:$0xff]  ;;  %v338_v15 = vld [vmem:[#allocation8 + $0x20] sm:$0xff]  ;;  %s1147_s9 = scalar_lea.vmem %s1647_s6, 2048  ;;  %p1724_p13 = scmp.ne.s32.totalorder %s1713_s30, 0 }
  0x99   : > { %891 = vmatpush3.bf16.msra.mxu0 %v890_v7  ;;  %v894_v13 = vpack.c.bf16 %v337_v10, %v336_v9  ;;  %v896_v14 = vpack.c.bf16 %v355_v12, %v354_v11  ;;  %v339_v16 = vld [vmem:[#allocation8 + $0x28] sm:$0xff]  ;;  %v356_v17 = vld [vmem:[#allocation8 + $0xb0] sm:$0xff]  ;;  %v357_v18 = vld [vmem:[#allocation8 + $0xb8] sm:$0xff]  ;;  %p1148_p1 = scmp.ne.s32.totalorder %s1647_s6, %s1147_s9  ;;  %s1236_s10 = smov [#allocation11]  }
  0x9a   : > { %893 = vmatprep.subr.bf16.mxu0 %v892_v8  ;;  %v898_v19 = vpack.c.bf16 %v339_v16, %v338_v15  ;;  %v900_v20 = vpack.c.bf16 %v357_v18, %v356_v17  ;;  %v340_v21 = vld [vmem:[#allocation8 + $0x30] sm:$0xff]  ;;  %v341_v22 = vld [vmem:[#allocation8 + $0x38] sm:$0xff]  ;;  %v358_v23 = vld [vmem:[#allocation8 + $0xc0] sm:$0xff]  ;;  %s1151_s3 = sshll.u32 %s1236_s10, 4  ;;  %s1152_s3 = int_to_ptr.vmem [resolvable:$false] %s1151_s3 }
  0x9b   : > { %v359_v24 = vld [vmem:[#allocation8 + $0xc8] sm:$0xff]  ;;  %v902_v26 = vpack.c.bf16 %v341_v22, %v340_v21  ;;  %v342_v28 = vld [vmem:[#allocation8 + $0x40] sm:$0xff]  ;;  %v360_v30 = vld [vmem:[#allocation8 + $0xd0] sm:$0xff]  ;;  %p1149_p6 = pnand %p1148_p1, %p1724_p13  ;;  %s1153_s19 = scalar_lea.vmem %s1152_s3, 4096 }
  0x9c   : > { %v1528_v25 = vld [vmem:[%s1505_s15 + $0x8] sm:$0xff]  ;;  %v904_v27 = vpack.c.bf16 %v359_v24, %v358_v23  ;;  %v361_v31 = vld [vmem:[#allocation8 + $0xd8] sm:$0xff]  ;;  %v344_v32 = vld [vmem:[#allocation8 + $0x50] sm:$0xff]  ;;  %p1154_p4 = scmp.lt.s32.totalorder %s1647_s6, %s1152_s3  ;;  %p1155_p7 = scmp.lt.s32.totalorder %s1153_s19, %s1147_s9 }
  0x9d   : > { %895 = vmatpush3.bf16.msra.mxu0 %v894_v13  ;;  %430 = vmatprep.mubr.f32.mxu0 %v1528_v25  ;;  %v343_v29 = vld [vmem:[#allocation8 + $0x48] sm:$0xff]  ;;  %v345_v33 = vld [vmem:[#allocation8 + $0x58] sm:$0xff]  ;;  %v362_v35 = vld [vmem:[#allocation8 + $0xe0] sm:$0xff]  ;;  %v908_v40 = vpack.c.bf16 %v361_v31, %v360_v30  ;;  %p1150_p10 = pneg %p1149_p6 }
  0x9e   : > { %897 = vmatprep.subr.bf16.mxu0 %v896_v14  ;;  %v906_v34 = vpack.c.bf16 %v343_v29, %v342_v28  ;;  %v363_v36 = vld [vmem:[#allocation8 + $0xe8] sm:$0xff]  ;;  %v499_v38 = vld [vmem:[#allocation9 + $0x18] sm:$0xff]  ;;  %v496_v39 = vld [vmem:[#allocation9] sm:$0xff]  ;;  %v910_v51 = vpack.c.bf16 %v345_v33, %v344_v32  ;;  %p1156_p3 = por %p1155_p7, %p1154_p4 }
  0x9f   : > { %v497_v37 = vld [vmem:[#allocation9 + $0x8] sm:$0xff]  ;;  %v498_v42 = vld [vmem:[#allocation9 + $0x10] sm:$0xff]  ;;  %v503_v44 = vld [vmem:[#allocation9 + $0x38] sm:$0xff]  ;;  %v912_v55 = vpack.c.bf16 %v363_v36, %v362_v35 }
  0xa0   : > { %v920_v41 = vpack.c.bf16 %v499_v38, %v497_v37  ;;  %v501_v43 = vld [vmem:[#allocation9 + $0x28] sm:$0xff]  ;;  %v922_v45 = vpack.c.bf16 %v498_v42, %v496_v39  ;;  %v500_v47 = vld [vmem:[#allocation9 + $0x20] sm:$0xff]  ;;  %v502_v48 = vld [vmem:[#allocation9 + $0x30] sm:$0xff]  ;;  %p1157_p5 = pnand %p1156_p3, %p1150_p10 }
  0xa1   : > { %899 = vmatpush3.bf16.msra.mxu0 %v898_v19  ;;  %v924_v46 = vpack.c.bf16 %v503_v44, %v501_v43  ;;  %v505_v49 = vld [vmem:[#allocation9 + $0x48] sm:$0xff]  ;;  %v507_v50 = vld [vmem:[#allocation9 + $0x58] sm:$0xff]  ;;  %v346_v52 = vld [vmem:[#allocation8 + $0x60] sm:$0xff]  ;;  %v926_v54 = vpack.c.bf16 %v502_v48, %v500_v47 }
  0xa2   : > { %901 = vmatprep.subr.bf16.mxu0 %v900_v20  ;;  %921 = vmatprep.subr.bf16.mxu1 %v920_v41  ;;  %v347_v53 = vld [vmem:[#allocation8 + $0x68] sm:$0xff]  ;;  %v364_v56 = vld [vmem:[#allocation8 + $0xf0] sm:$0xff]  ;;  %v928_v57 = vpack.c.bf16 %v507_v50, %v505_v49  ;;  %v504_v58 = vld [vmem:[#allocation9 + $0x40] sm:$0xff]  ;;  %v1235_v49 = vmov 0.0  }
  0xa3   : > { %923 = vmatpush1.bf16.msra.mxu1 %v922_v45  ;;  %v506_v59 = vld [vmem:[#allocation9 + $0x50] sm:$0xff]  ;;  %v365_v60 = vld [vmem:[#allocation8 + $0xf8] sm:$0xff]  ;;  %v509_v61 = vld [vmem:[#allocation9 + $0x68] sm:$0xff]  ;;  %v914_v63 = vpack.c.bf16 %v347_v53, %v346_v52  ;;  %592 = vmatprep.mubr.f32.mxu1 %v1235_v49 }
  0xa4   : > { %925 = vmatprep.subr.bf16.mxu1 %v924_v46  ;;  %v511_v62 = vld [vmem:[#allocation9 + $0x78] sm:$0xff]  ;;  %v348_v0 = vld [vmem:[#allocation8 + $0x70] sm:$0xff]  ;;  %v930_v1 = vpack.c.bf16 %v506_v59, %v504_v58  ;;  %v916_v2 = vpack.c.bf16 %v365_v60, %v364_v56  ;;  %v508_v5 = vld [vmem:[#allocation9 + $0x60] sm:$0xff] }
  0xa5   : > { %903 = vmatpush3.bf16.msra.mxu0 %v902_v26  ;;  %v349_v3 = vld [vmem:[#allocation8 + $0x78] sm:$0xff]  ;;  %v932_v4 = vpack.c.bf16 %v511_v62, %v509_v61  ;;  %v510_v6 = vld [vmem:[#allocation9 + $0x70] sm:$0xff]  ;;  %v513_v7 = vld [vmem:[#allocation9 + $0x88] sm:$0xff] }
  0xa6   : > { %905 = vmatprep.subr.bf16.mxu0 %v904_v27  ;;  %v515_v8 = vld [vmem:[#allocation9 + $0x98] sm:$0xff]  ;;  %v918_v9 = vpack.c.bf16 %v349_v3, %v348_v0  ;;  %v934_v10 = vpack.c.bf16 %v510_v6, %v508_v5  ;;  %v512_v12 = vld [vmem:[#allocation9 + $0x80] sm:$0xff]  ;;  %v514_v13 = vld [vmem:[#allocation9 + $0x90] sm:$0xff] }
  0xa7   : > { %927 = vmatpush1.bf16.msra.mxu1 %v926_v54  ;;  %v936_v11 = vpack.c.bf16 %v515_v8, %v513_v7  ;;  %v517_v14 = vld [vmem:[#allocation9 + $0xa8] sm:$0xff]  ;;  %v519_v15 = vld [vmem:[#allocation9 + $0xb8] sm:$0xff]  ;;  %v1532_v16 = vld [vmem:[%s1505_s15] sm:$0xff]  ;;  %v938_v17 = vpack.c.bf16 %v514_v13, %v512_v12  ;;  %v487_v54 = vstv %s317_s25 }
  0xa8   : > { %929 = vmatprep.subr.bf16.mxu1 %v928_v57  ;;  %v1535_v18 = vld [vmem:[%s1505_s15 + $0x18] sm:$0xff]  ;;  %v940_v19 = vpack.c.bf16 %v519_v15, %v517_v14  ;;  %v516_v20 = vld [vmem:[#allocation9 + $0xa0] sm:$0xff]  ;;  %v518_v21 = vld [vmem:[#allocation9 + $0xb0] sm:$0xff] }
  0xa9   : > { %907 = vmatpush3.bf16.msra.mxu0 %v906_v34  ;;  %v1540_v22 = vld [vmem:[%s1505_s15 + $0x10] sm:$0xff]  ;;  %v942_v23 = vpack.c.bf16 %v518_v21, %v516_v20  ;;  %v1543_v24 = vld [vmem:[%s1505_s15 + $0x28] sm:$0xff]  ;;  %v1548_v26 = vld [vmem:[%s1505_s15 + $0x20] sm:$0xff] }
  0xaa   : > { %909 = vmatprep.subr.bf16.mxu0 %v908_v40  ;;  %v1551_v27 = vld [vmem:[%s1505_s15 + $0x38] sm:$0xff]  ;;  %v1556_v28 = vld [vmem:[%s1505_s15 + $0x30] sm:$0xff]  ;;  %v1559_v29 = vld [vmem:[%s1505_s15 + $0x48] sm:$0xff] }
  0xab   : > { %931 = vmatpush1.bf16.msra.mxu1 %v930_v1  ;;  %v1564_v30 = vld [vmem:[%s1505_s15 + $0x40] sm:$0xff]  ;;  %v1567_v31 = vld [vmem:[%s1505_s15 + $0x58] sm:$0xff]  ;;  %v1572_v32 = vld [vmem:[%s1505_s15 + $0x50] sm:$0xff] }
  0xac   : > { %933 = vmatprep.subr.bf16.mxu1 %v932_v4  ;;  %v1575_v33 = vld [vmem:[%s1505_s15 + $0x68] sm:$0xff]  ;;  %v1580_v34 = vld [vmem:[%s1505_s15 + $0x60] sm:$0xff]  ;;  %v1583_v35 = vld [vmem:[%s1505_s15 + $0x78] sm:$0xff] }
  0xad   : > { %911 = vmatpush3.bf16.msra.mxu0 %v910_v51  ;;  %v1588_v36 = vld [vmem:[%s1505_s15 + $0x70] sm:$0xff]  ;;  %v521_v37 = vld [vmem:[#allocation9 + $0xc8] sm:$0xff]  ;;  %v523_v38 = vld [vmem:[#allocation9 + $0xd8] sm:$0xff] }
  0xae   : > { %913 = vmatprep.subr.bf16.mxu0 %v912_v55  ;;  %v944_v39 = vpack.c.bf16 %v523_v38, %v521_v37  ;;  %v520_v40 = vld [vmem:[#allocation9 + $0xc0] sm:$0xff]  ;;  %v522_v41 = vld [vmem:[#allocation9 + $0xd0] sm:$0xff]  ;;  %v525_v43 = vld [vmem:[#allocation9 + $0xe8] sm:$0xff] }
  0xaf   : > { %935 = vmatpush1.bf16.msra.mxu1 %v934_v10  ;;  %v946_v42 = vpack.c.bf16 %v522_v41, %v520_v40  ;;  %v527_v44 = vld [vmem:[#allocation9 + $0xf8] sm:$0xff]  ;;  %v524_v46 = vld [vmem:[#allocation9 + $0xe0] sm:$0xff]  ;;  %v526_v47 = vld [vmem:[#allocation9 + $0xf0] sm:$0xff] }
  0xb0   : > { %937 = vmatprep.subr.bf16.mxu1 %v936_v11  ;;  %v948_v45 = vpack.c.bf16 %v527_v44, %v525_v43  ;;  %v950_v48 = vpack.c.bf16 %v526_v47, %v524_v46  ;;  %v471_v52 = vld [vmem:[%s1513_s8] sm:$0xff]  ;;  %v472_v58 = vld [vmem:[%s1513_s8 + $0x8] sm:$0xff]  ;;  %v473_v0 = vld [vmem:[%s1513_s8 + $0x10] sm:$0xff] }
  0xb1   : > { %915 = vmatpush3.bf16.msra.mxu0 %v914_v63  ;;  %v474_v6 = vld [vmem:[%s1513_s8 + $0x18] sm:$0xff]  ;;  %v475_v12 = vld [vmem:[%s1513_s8 + $0x20] sm:$0xff]  ;;  %v476_v20 = vld [vmem:[%s1513_s8 + $0x28] sm:$0xff] }
  0xb2   : > { %917 = vmatprep.subr.bf16.mxu0 %v916_v2  ;;  %v477_v40 = vld [vmem:[%s1513_s8 + $0x30] sm:$0xff]  ;;  %v478_v46 = vld [vmem:[%s1513_s8 + $0x38] sm:$0xff] }
  0xb3   : > { %939 = vmatpush1.bf16.msra.mxu1 %v938_v17 }
  0xb4   : > { %941 = vmatprep.subr.bf16.mxu1 %v940_v19 }
  0xb5   : > { %919 = vmatpush3.bf16.msra.mxu0 %v918_v9 }
  0xb7   : > { %943 = vmatpush1.bf16.msra.mxu1 %v942_v23 }
  0xb8   : > { %431 = vmatmul.mubr.f32.vlgmr.msra.gmra.mrb[0].mxu0 %v1532_v16  ;;  %945 = vmatprep.subr.bf16.mxu1 %v944_v39 }
  0xb9   : > { %435 = vmatprep.mubr.f32.mxu0 %v1535_v18 }
  0xbb   : > { %947 = vmatpush1.bf16.msra.mxu1 %v946_v42 }
  0xbc   : > { %436 = vmatmul.mubr.f32.gmra.mrb[2].mxu0 %v1540_v22  ;;  %949 = vmatprep.subr.bf16.mxu1 %v948_v45 }
  0xbd   : > { %440 = vmatprep.mubr.f32.mxu0 %v1543_v24 }
  0xbf   : > { %951 = vmatpush1.bf16.msra.mxu1 %v950_v48 }
  0xc0   : > { %441 = vmatmul.mubr.f32.gmra.mrb[4].mxu0 %v1548_v26 }
  0xc1   : > { %445 = vmatprep.mubr.f32.mxu0 %v1551_v27 }
  0xc4   : > { %446 = vmatmul.mubr.f32.gmra.mrb[6].mxu0 %v1556_v28 }
  0xc5   : > { %450 = vmatprep.mubr.f32.mxu0 %v1559_v29 }
  0xc8   : > { %451 = vmatmul.mubr.f32.gmra.mrb[8].mxu0 %v1564_v30 }
  0xc9   : > { %455 = vmatprep.mubr.f32.mxu0 %v1567_v31 }
  0xcc   : > { %456 = vmatmul.mubr.f32.gmra.mrb[10].mxu0 %v1572_v32 }
  0xcd   : > { %460 = vmatprep.mubr.f32.mxu0 %v1575_v33 }
  0xd0   : > { %461 = vmatmul.mubr.f32.gmra.mrb[12].mxu0 %v1580_v34 }
  0xd1   : > { %465 = vmatprep.mubr.f32.mxu0 %v1583_v35 }
  0xd4   : > { %466 = vmatmul.mubr.f32.gmra.mrb[14].mxu0 %v1588_v36 }
 0x18b   : > { %v864_v50 = vpop.f32.mrb[0].mxu0 }
 0x18c   : > { %v865_v51 = vpop.f32.mrb[1].mxu0 }
 0x18d   : > { %v866_v53 = vadd.f32 %v865_v51, %v864_v50 }
 0x18f   : > { %v479_v55 = vsub.f32 %v866_v53, %v471_v52  ;;  %v867_v56 = vpop.f32.mrb[2].mxu0 }
 0x190   : > { %v868_v57 = vpop.f32.mrb[3].mxu0 }
 0x191   : > { %v869_v59 = vadd.f32 %v868_v57, %v867_v56  ;;  %v488_v60 = vmul.f32 %v487_v54, %v479_v55 }
 0x193   : > { %v480_v61 = vsub.f32 %v869_v59, %v472_v58  ;;  %v870_v62 = vpop.f32.mrb[4].mxu0  ;;  %593 = vmatmul.mubr.f32.vlgmr.msra.gmra.mrb[0].mxu1 %v488_v60 }
 0x194   : > { %v871_v63 = vpop.f32.mrb[5].mxu0  ;;  %598 = vmatprep.mubr.f32.mxu1 %v1235_v49 }
 0x195   : > { %v872_v1 = vadd.f32 %v871_v63, %v870_v62  ;;  %v489_v2 = vmul.f32 %v487_v54, %v480_v61 }
 0x197   : > { %v481_v3 = vsub.f32 %v872_v1, %v473_v0  ;;  %v873_v4 = vpop.f32.mrb[6].mxu0  ;;  %599 = vmatmul.mubr.f32.gmra.mrb[2].mxu1 %v489_v2 }
 0x198   : > { %v874_v5 = vpop.f32.mrb[7].mxu0  ;;  %604 = vmatprep.mubr.f32.mxu1 %v1235_v49 }
 0x199   : > { %v875_v7 = vadd.f32 %v874_v5, %v873_v4  ;;  %v490_v8 = vmul.f32 %v487_v54, %v481_v3 }
 0x19b   : > { %v482_v9 = vsub.f32 %v875_v7, %v474_v6  ;;  %v876_v10 = vpop.f32.mrb[8].mxu0  ;;  %605 = vmatmul.mubr.f32.gmra.mrb[4].mxu1 %v490_v8 }
 0x19c   : > { %v877_v11 = vpop.f32.mrb[9].mxu0  ;;  %610 = vmatprep.mubr.f32.mxu1 %v1235_v49 }
 0x19d   : > { %v878_v13 = vadd.f32 %v877_v11, %v876_v10  ;;  %v491_v14 = vmul.f32 %v487_v54, %v482_v9 }
 0x19f   : > { %v483_v15 = vsub.f32 %v878_v13, %v475_v12  ;;  %v879_v17 = vpop.f32.mrb[10].mxu0  ;;  %611 = vmatmul.mubr.f32.gmra.mrb[6].mxu1 %v491_v14 }
 0x1a0   : > { %v880_v19 = vpop.f32.mrb[11].mxu0  ;;  %616 = vmatprep.mubr.f32.mxu1 %v1235_v49 }
 0x1a1   : > { %v881_v21 = vadd.f32 %v880_v19, %v879_v17  ;;  %v492_v23 = vmul.f32 %v487_v54, %v483_v15 }
 0x1a3   : > { %v484_v37 = vsub.f32 %v881_v21, %v476_v20  ;;  %v882_v38 = vpop.f32.mrb[12].mxu0  ;;  %617 = vmatmul.mubr.f32.gmra.mrb[8].mxu1 %v492_v23 }
 0x1a4   : > { %v883_v39 = vpop.f32.mrb[13].mxu0  ;;  %622 = vmatprep.mubr.f32.mxu1 %v1235_v49 }
 0x1a5   : > { %v884_v41 = vadd.f32 %v883_v39, %v882_v38  ;;  %v493_v42 = vmul.f32 %v487_v54, %v484_v37 }
 0x1a7   : > { %v485_v43 = vsub.f32 %v884_v41, %v477_v40  ;;  %v885_v44 = vpop.f32.mrb[14].mxu0  ;;  %623 = vmatmul.mubr.f32.gmra.mrb[10].mxu1 %v493_v42 }
 0x1a8   : > { %v886_v45 = vpop.f32.mrb[15].mxu0  ;;  %628 = vmatprep.mubr.f32.mxu1 %v1235_v49 }
 0x1a9   : > { %v887_v47 = vadd.f32 %v886_v45, %v885_v44  ;;  %v494_v48 = vmul.f32 %v487_v54, %v485_v43 }
 0x1ab   : > { %v486_v50 = vsub.f32 %v887_v47, %v478_v46  ;;  %629 = vmatmul.mubr.f32.gmra.mrb[12].mxu1 %v494_v48 }
 0x1ac   : > { %634 = vmatprep.mubr.f32.mxu1 %v1235_v49 }
 0x1ad   : > { %v495_v51 = vmul.f32 %v487_v54, %v486_v50 }
 0x1af   : > { %635 = vmatmul.mubr.f32.gmra.mrb[14].mxu1 %v495_v51 }
 0x266   : > { %v594_v52 = vpop.f32.mrb[0].mxu1 }
 0x267   : > { %v641_v53 = vsub.f32 %v1532_v16, %v594_v52  ;;  %v596_v55 = vpop.f32.mrb[1].mxu1 }
 0x268   : > { %v642_v56 = vsub.f32 %v1528_v25, %v596_v55 }
 0x269   : > { %657 = vst [vmem:[%s1611_s12] sm:$0xff] %v641_v53 }
 0x26a   : > { %658 = vst [vmem:[%s1611_s12 + $0x8] sm:$0xff] %v642_v56  ;;  %v600_v49 = vpop.f32.mrb[2].mxu1 }
 0x26b   : > { %v643_v54 = vsub.f32 %v1540_v22, %v600_v49  ;;  %v602_v16 = vpop.f32.mrb[3].mxu1 }
 0x26c   : > { %v644_v57 = vsub.f32 %v1535_v18, %v602_v16 }
 0x26d   : > { %659 = vst [vmem:[%s1611_s12 + $0x10] sm:$0xff] %v643_v54 }
 0x26e   : > { %660 = vst [vmem:[%s1611_s12 + $0x18] sm:$0xff] %v644_v57  ;;  %v606_v25 = vpop.f32.mrb[4].mxu1 }
 0x26f   : > { %v645_v58 = vsub.f32 %v1548_v26, %v606_v25  ;;  %v608_v59 = vpop.f32.mrb[5].mxu1 }
 0x270   : > { %v646_v60 = vsub.f32 %v1543_v24, %v608_v59 }
 0x271   : > { %661 = vst [vmem:[%s1611_s12 + $0x20] sm:$0xff] %v645_v58 }
 0x272   : > { %662 = vst [vmem:[%s1611_s12 + $0x28] sm:$0xff] %v646_v60  ;;  %v612_v61 = vpop.f32.mrb[6].mxu1 }
 0x273   : > { %v647_v22 = vsub.f32 %v1556_v28, %v612_v61  ;;  %v614_v62 = vpop.f32.mrb[7].mxu1 }
 0x274   : > { %v648_v18 = vsub.f32 %v1551_v27, %v614_v62 }
 0x275   : > { %663 = vst [vmem:[%s1611_s12 + $0x30] sm:$0xff] %v647_v22 }
 0x276   : > { %664 = vst [vmem:[%s1611_s12 + $0x38] sm:$0xff] %v648_v18  ;;  %v618_v63 = vpop.f32.mrb[8].mxu1 }
 0x277   : > { %v649_v26 = vsub.f32 %v1564_v30, %v618_v63  ;;  %v620_v0 = vpop.f32.mrb[9].mxu1 }
 0x278   : > { %v650_v24 = vsub.f32 %v1559_v29, %v620_v0 }
 0x279   : > { %665 = vst [vmem:[%s1611_s12 + $0x40] sm:$0xff] %v649_v26 }
 0x27a   : > { %666 = vst [vmem:[%s1611_s12 + $0x48] sm:$0xff] %v650_v24  ;;  %v624_v1 = vpop.f32.mrb[10].mxu1 }
 0x27b   : > { %v651_v28 = vsub.f32 %v1572_v32, %v624_v1  ;;  %v626_v2 = vpop.f32.mrb[11].mxu1 }
 0x27c   : > { %v652_v27 = vsub.f32 %v1567_v31, %v626_v2 }
 0x27d   : > { %667 = vst [vmem:[%s1611_s12 + $0x50] sm:$0xff] %v651_v28 }
 0x27e   : > { %668 = vst [vmem:[%s1611_s12 + $0x58] sm:$0xff] %v652_v27  ;;  %v630_v3 = vpop.f32.mrb[12].mxu1 }
 0x27f   : > { %v653_v30 = vsub.f32 %v1580_v34, %v630_v3  ;;  %v632_v4 = vpop.f32.mrb[13].mxu1 }
 0x280   : > { %v654_v29 = vsub.f32 %v1575_v33, %v632_v4 }
 0x281   : > { %669 = vst [vmem:[%s1611_s12 + $0x60] sm:$0xff] %v653_v30 }
 0x282   : > { %670 = vst [vmem:[%s1611_s12 + $0x68] sm:$0xff] %v654_v29  ;;  %v636_v32 = vpop.f32.mrb[14].mxu1 }
 0x283   : > { %v655_v5 = vsub.f32 %v1588_v36, %v636_v32  ;;  %v638_v31 = vpop.f32.mrb[15].mxu1 }
 0x284   : > { %v656_v33 = vsub.f32 %v1583_v35, %v638_v31 }
 0x285   : > { %671 = vst [vmem:[%s1611_s12 + $0x70] sm:$0xff] %v655_v5 }
 0x286   : > { %672 = vst [vmem:[%s1611_s12 + $0x78] sm:$0xff] %v656_v33 }
 0x287   : > { %1160 = shalt.err (!%p1157_p5)
}
 0x288   : > { %s1161_s17 = scalar_lea.hbm %s1645_s24, 2048  ;;  %s1165_s1 = scalar_lea.hbm %s1699_s5, 4096 }
 0x289   : > { %p1162_p9 = scmp.ne.s32.totalorder %s1645_s24, %s1161_s17  ;;  %p1166_p11 = scmp.lt.u32.totalorder %s1645_s24, %s1699_s5 }
 0x28a   : > { %p1167_p2 = scmp.lt.u32.totalorder %s1165_s1, %s1161_s17  ;;  %p1169_p1 = scmp.lt.u32.totalorder %s1161_s17, %s1645_s24 }
 0x28b   : > { %p1163_p0 = pnand %p1162_p9, %p1724_p13 }
 0x28c   : > { %p1168_p12 = por %p1167_p2, %p1166_p11 }
 0x28d   : > { %p1164_p8 = pneg %p1163_p0 }
 0x28e   : > { %p1170_p6 = por %p1169_p1, %p1168_p12 }
 0x290   : > { %p1171_p10 = pnand %p1170_p6, %p1164_p8 }
 0x292   : > { %1174 = shalt.err (!%p1171_p10)
}
 0x293   : > { %s1237_s8 = smov 256   ;;  %s1238_s25 = smov 16  }
 0x294   : > { %964 = dma.vmem_to_hbm [thread:$0]  (%p1724_p13), %s1647_s6, 2048, %s1645_s24, %s674_s0, %s1237_s8, %s1237_s8, %s1238_s25  }
 0x295 PF: > { %s703_s12 = sand.u32 1, %s1213_s20   ;;  %p1725_p4 = scmp.ne.s32.totalorder %s1708_s26, 0 }
 0x296   : > { %p1726_p7 = scmp.ge.s32.totalorder %s1225_s23, 2  ;;  %s704_s13 = scalar_lea.sflag [#allocation5], %s703_s12 }
 0x298   : > { %p981_p3 = pnand %p1726_p7, %p1725_p4 }
 0x29a   : > { %1208 = dma.done.wait (!%p981_p3), %s704_s13, 2048  }
 0x29b   : > { %1210 = vsyncadd (!%p981_p3), %s704_s13, 4294965248  ;;  %p23_p5 = scmp.ge.s32.totalorder %s1388_s18, 4   ;;  %s1727_s20 = smov %s1217_s21 }
 0x29c   : > { %s1728_s21 = smov %s1221_s22  ;;  %s1729_s22 = smov %s1397_s28 }
 0x29d   : > { %s1730_s23 = smov %s1388_s18  ;;  %25 = sbr.rel (!%p23_p5) target bundleno = 12 (0xc), region = 106 }
 0x2a4   :  { %709 = vsyncpa [#allocation4], 1 }
 0x2a5   :  { %711 = vsyncpa [#allocation4 + $0x1], 1 }
 0x2a6   :  { %712 = vsyncpa [#allocation7], 1 }
 0x2a7   :  { %714 = vsyncpa [#allocation7 + $0x1], 1 }
 0x2a8   :  { %715 = vsyncpa [#allocation10], 1 }
 0x2a9   :  { %716 = vsyncpa [#allocation5], 1 }
 0x2aa   :  { %718 = vsyncpa [#allocation5 + $0x1], 1 }

// kernel: tpu_custom_call.1
= control target key start
LH: loop header
LB: loop body
LE: loop exit
PB: predicated region body
PF: predicated region fallthrough
CT: control target
= control target key end

     0   :  { %s1694_s0 = inlined_call_operand.<no memory space> [shape: f32[1], index: 0, kind: input, shape index: {}]   ;;  %s1695_s1 = inlined_call_operand.hbm [shape: f32[128,256], index: 1, kind: input, shape index: {}]   ;;  %s1696_s2 = inlined_call_operand.hbm [shape: f32[128,128], index: 2, kind: input, shape index: {}]   ;;  %s1697_s3 = inlined_call_operand.hbm [shape: f32[256,128], index: 3, kind: input, shape index: {}]   ;;  %s1698_s4 = inlined_call_operand.hbm [shape: f32[128,256], index: 4, kind: input, shape index: {}]   ;;  %s1699_s5 = inlined_call_operand.hbm [shape: f32[128,256], index: 5, kind: output, shape index: {}]  }
   0x1   :  { %1705 = sst [smem:[#allocation17_spill]] %s1695_s1 }
   0x2   :  { %1706 = sst [smem:[#allocation18_spill]] %s1697_s3 }
   0x3   :  { %10 = sst [smem:[#allocation2]] %s1694_s0 }
   0x4   :  { %11 = vsyncpa [#allocation4], 0 }
   0x5   :  { %13 = vsyncpa [#allocation4 + $0x1], 0 }
   0x6   :  { %14 = vsyncpa [#allocation7], 0 }
   0x7   :  { %16 = vsyncpa [#allocation7 + $0x1], 0 }
   0x8   :  { %17 = vsyncpa [#allocation10], 0 }
   0x9   :  { %18 = vsyncpa [#allocation5], 0 }
   0xa   :  { %20 = vsyncpa [#allocation5 + $0x1], 0  ;;  %s1272_s20 = smov 0   ;;  %s1274_s21 = smov 0  }
   0xb   :  { %s1276_s22 = smov 0   ;;  %s1278_s23 = smov 0  }
   0xc LB: > { %s1293_s0 = sadd.s32 4294967295, %s1225_s23   ;;  %s803_s24 = sadd.s32 4294967294, %s1225_s23   ;;  %s1225_s23 = sphi %s1278_s23, %s1730_s23   ;;  %s1221_s22 = sphi %s1276_s22, %s1729_s22   ;;  %s1217_s21 = sphi %s1274_s21, %s1728_s21   ;;  %s1213_s20 = sphi %s1272_s20, %s1727_s20  }
   0xd   : > { %p67_p0 = scmp.ne.s32.totalorder %s1217_s21, %s1213_s20  ;;  %p1700_p1 = scmp.eq.s32.totalorder %s1293_s0, 0 }
   0xe   : > { %p165_p3 = scmp.eq.s32.totalorder %s803_s24, 1  ;;  %p804_p5 = scmp.ge.s32.totalorder %s1225_s23, 1 }
   0xf   : > { %p1302_p4 = por %p1700_p1, %p67_p0  ;;  %p172_p7 = scmp.lt.s32.totalorder %s1225_s23, 3 }
  0x10   : > { %p1307_p6 = por %p165_p3, %p67_p0  ;;  %s1227_s28 = smov [#allocation8]  }
  0x11   : > { %s1707_s25 = scalar_select %p1302_p4, 1, 0 }
  0x12   : > { %s1708_s26 = scalar_select %p1307_p6, 1, 0 }
  0x13   : > { %p1312_p8 = pnand %p804_p5, %p172_p7  ;;  %s187_s29 = sshll.u32 %s1227_s28, 4  ;;  %s1316_s29 = int_to_ptr.vmem [resolvable:$true] %s187_s29 }
  0x14   : > { %s1228_s6 = smov [#allocation9]   ;;  %s1711_s3 = sld [smem:[#allocation18_spill]] }
  0x15   : > { %p966_p9 = pneg %p1312_p8  ;;  %s200_s7 = sshll.u32 %s1228_s6, 4  ;;  %s1327_s7 = int_to_ptr.vmem [resolvable:$true] %s200_s7 }
  0x17   : > { %p1323_p11 = pnand %p966_p9, %p1700_p1 }
  0x19   : > { %p1033_p13 = pneg %p1323_p11 }
  0x1a   : > { %s1031_s10 = scalar_lea.hbm %s1711_s3, 4096 }
  0x1b   : > { %p1032_p12 = scmp.ne.s32.totalorder %s1711_s3, %s1031_s10  ;;  %p1038_p5 = scmp.lt.u32.totalorder %s1031_s10, %s1711_s3 }
  0x1d   : > { %p1034_p0 = pnand %p1033_p13, %p1032_p12 }
  0x1f   : > { %p1035_p3 = pneg %p1034_p0 }
  0x21   : > { %p1040_p7 = pnand %p1038_p5, %p1035_p3 }
  0x23   : > { %1043 = shalt.err (!%p1040_p7)
}
  0x24   : > { %s1044_s15 = scalar_lea.vmem %s1316_s29, 4096  ;;  %p1052_p2 = scmp.lt.s32.totalorder %s1316_s29, %s1316_s29 }
  0x25   : > { %p1045_p9 = scmp.ne.s32.totalorder %s1316_s29, %s1044_s15  ;;  %p1053_p12 = scmp.lt.s32.totalorder %s1044_s15, %s1044_s15 }
  0x27   : > { %p1047_p10 = pnand %p1045_p9, %p1033_p13  ;;  %p1054_p0 = por %p1053_p12, %p1052_p2 }
  0x29   : > { %p1048_p1 = pneg %p1047_p10 }
  0x2b   : > { %p1055_p6 = pnand %p1054_p0, %p1048_p1 }
  0x2d   : > { %1058 = shalt.err (!%p1055_p6)
}
  0x2e   : > { %s1701_s16 = smov 128   ;;  %s1702_s17 = smov 8  }
  0x2f   : > { %969 = dma.hbm_to_vmem [thread:$0]  (!%p1323_p11), %s1711_s3, 4096, %s1316_s29, [#allocation7], %s1701_s16, %s1701_s16, %s1702_s17  }
  0x30   : > { %s1059_s6 = scalar_lea.hbm %s1698_s4, 4096 }
  0x31   : > { %p1060_p1 = scmp.ne.s32.totalorder %s1698_s4, %s1059_s6  ;;  %p1066_p10 = scmp.lt.u32.totalorder %s1059_s6, %s1698_s4 }
  0x33   : > { %p1062_p2 = pnand %p1060_p1, %p1033_p13 }
  0x35   : > { %p1063_p6 = pneg %p1062_p2 }
  0x37   : > { %p1068_p3 = pnand %p1066_p10, %p1063_p6 }
  0x39   : > { %1071 = shalt.err (!%p1068_p3)
}
  0x3a   : > { %s1072_s29 = scalar_lea.vmem %s1327_s7, 4096  ;;  %p1080_p12 = scmp.lt.s32.totalorder %s1327_s7, %s1327_s7 }
  0x3b   : > { %p1073_p5 = scmp.ne.s32.totalorder %s1327_s7, %s1072_s29  ;;  %p1081_p0 = scmp.lt.s32.totalorder %s1072_s29, %s1072_s29 }
  0x3d   : > { %p1075_p7 = pnand %p1073_p5, %p1033_p13  ;;  %p1082_p1 = por %p1081_p0, %p1080_p12 }
  0x3f   : > { %p1076_p9 = pneg %p1075_p7 }
  0x41   : > { %p1083_p2 = pnand %p1082_p1, %p1076_p9 }
  0x43   : > { %1086 = shalt.err (!%p1083_p2)
}
  0x44   : > { %s1231_s12 = smov 256   ;;  %s1232_s13 = smov 16  }
  0x45   : > { %972 = dma.hbm_to_vmem [thread:$0]  (!%p1323_p11), %s1698_s4, 4096, %s1327_s7, [#allocation10], %s1231_s12, %s1231_s12, %s1232_s13  }
  0x46   : > { %s1388_s18 = sadd.s32 1, %s1225_s23   ;;  %s54_s24 = sadd.s32 1, %s1221_s22 }
  0x47   : > { %s51_s19 = ssub.s32 %s1225_s23, %s1388_s18  ;;  %p61_p6 = scmp.ne.s32.totalorder %s1221_s22, %s1217_s21 }
  0x48   : > { %p52_p13 = scmp.eq.s32.totalorder %s51_s19, 0  ;;  %p62_p10 = scmp.eq.s32.totalorder %s1225_s23, 0 }
  0x49   : > { %p1712_p5 = scmp.eq.s32.totalorder %s1293_s0, 1  ;;  %p986_p9 = scmp.lt.s32.totalorder %s1225_s23, 2 }
  0x4a   : > { %s1397_s28 = scalar_select %p52_p13, %s1221_s22, %s54_s24  }
  0x4b   : > { %p63_p3 = por %p62_p10, %p61_p6  ;;  %p1401_p7 = por %p1712_p5, %p61_p6 }
  0x4c   : > { %s1407_s6 = sand.u32 1, %s1221_s22   ;;  %s828_s8 = sshll.u32 %s1225_s23, 11 }
  0x4d   : > { %s1713_s30 = scalar_select %p1401_p7, 1, 0 }
  0x4e   : > { %s808_s7 = sshll.u32 %s1407_s6, 7  ;;  %s1714_s1 = sld [smem:[#allocation17_spill]] }
  0x4f   : > { %s218_s29 = scalar_lea.vmem [#allocation3], %s808_s7  ;;  %p1418_p11 = pnand %p986_p9, %p63_p3 }
  0x50   : > { %s226_s14 = sshll.u32 %s218_s29, 4  ;;  %s812_s24 = sshll.u32 %s1407_s6, 6  ;;  %s1416_s14 = int_to_ptr.vmem [resolvable:$true] %s226_s14 }
  0x51   : > { %s215_s16 = scalar_lea.sflag [#allocation4], %s1407_s6  ;;  %p1089_p0 = pneg %p1418_p11 }
  0x54   : > { %s1414_s11 = scalar_lea.hbm %s1714_s1, %s828_s8  ;;  %s1092_s10 = scalar_lea.hbm %s1714_s1, 4096 }
  0x55   : > { %s1087_s9 = scalar_lea.hbm %s1414_s11, 2048  ;;  %p1093_p13 = scmp.lt.u32.totalorder %s1414_s11, %s1714_s1 }
  0x56   : > { %p1088_p12 = scmp.ne.s32.totalorder %s1414_s11, %s1087_s9  ;;  %p1094_p6 = scmp.lt.u32.totalorder %s1092_s10, %s1087_s9 }
  0x57   : > { %p1096_p3 = scmp.lt.u32.totalorder %s1087_s9, %s1414_s11 }
  0x58   : > { %p1090_p1 = pnand %p1089_p0, %p1088_p12  ;;  %p1095_p10 = por %p1094_p6, %p1093_p13 }
  0x5a   : > { %p1091_p2 = pneg %p1090_p1  ;;  %p1097_p5 = por %p1096_p3, %p1095_p10 }
  0x5c   : > { %p1098_p9 = pnand %p1097_p5, %p1091_p2 }
  0x5e   : > { %1101 = shalt.err (!%p1098_p9)
}
  0x5f   : > { %s1102_s19 = scalar_lea.vmem %s1416_s14, 2048  ;;  %s1233_s7 = smov [#allocation3]  }
  0x60   : > { %p1103_p12 = scmp.ne.s32.totalorder %s1416_s14, %s1102_s19  ;;  %s1107_s8 = sshll.u32 %s1233_s7, 4  ;;  %s1108_s8 = int_to_ptr.vmem [resolvable:$false] %s1107_s8 }
  0x61   : > { %s1109_s17 = scalar_lea.vmem %s1108_s8, 4096  ;;  %p1110_p4 = scmp.lt.s32.totalorder %s1416_s14, %s1108_s8 }
  0x62   : > { %p1105_p1 = pnand %p1103_p12, %p1089_p0  ;;  %p1111_p13 = scmp.lt.s32.totalorder %s1109_s17, %s1102_s19 }
  0x64   : > { %p1106_p7 = pneg %p1105_p1  ;;  %p1112_p6 = por %p1111_p13, %p1110_p4 }
  0x66   : > { %p1113_p10 = pnand %p1112_p6, %p1106_p7 }
  0x68   : > { %1116 = shalt.err (!%p1113_p10)
}
  0x69   : > { %976 = dma.hbm_to_vmem [thread:$0]  (!%p1418_p11), %s1414_s11, 2048, %s1416_s14, %s215_s16, %s1231_s12, %s1231_s12, %s1232_s13  }
  0x6a   : > { %s829_s9 = sshll.u32 %s1225_s23, 10  ;;  %s240_s7 = scalar_lea.vmem [#allocation6], %s812_s24 }
  0x6b   : > { %s1459_s29 = scalar_lea.hbm %s1696_s2, %s829_s9  ;;  %s247_s8 = sshll.u32 %s240_s7, 4  ;;  %s1463_s8 = int_to_ptr.vmem [resolvable:$true] %s247_s8 }
  0x6c   : > { %s1716_s17 = sand.u32 1, %s1225_s23   ;;  %s1117_s3 = scalar_lea.hbm %s1459_s29, 1024 }
  0x6d   : > { %s1467_s1 = scalar_lea.sflag [#allocation7], %s1716_s17  ;;  %p1118_p4 = scmp.ne.s32.totalorder %s1459_s29, %s1117_s3 }
  0x6e   : > { %s1122_s13 = scalar_lea.hbm %s1696_s2, 2048  ;;  %p1123_p3 = scmp.lt.u32.totalorder %s1459_s29, %s1696_s2 }
  0x6f   : > { %p1120_p7 = pnand %p1118_p4, %p1089_p0  ;;  %p1124_p5 = scmp.lt.u32.totalorder %s1122_s13, %s1117_s3 }
  0x70   : > { %p1126_p12 = scmp.lt.u32.totalorder %s1117_s3, %s1459_s29 }
  0x71   : > { %p1121_p2 = pneg %p1120_p7  ;;  %p1125_p9 = por %p1124_p5, %p1123_p3 }
  0x73   : > { %p1127_p1 = por %p1126_p12, %p1125_p9 }
  0x75   : > { %p1128_p13 = pnand %p1127_p1, %p1121_p2 }
  0x77   : > { %1131 = shalt.err (!%p1128_p13)
}
  0x78   : > { %s1132_s14 = scalar_lea.vmem %s1463_s8, 1024  ;;  %s1234_s24 = smov [#allocation6]  }
  0x79   : > { %p1133_p6 = scmp.ne.s32.totalorder %s1463_s8, %s1132_s14  ;;  %s1137_s9 = sshll.u32 %s1234_s24, 4  ;;  %s1138_s9 = int_to_ptr.vmem [resolvable:$false] %s1137_s9 }
  0x7a   : > { %s1139_s10 = scalar_lea.vmem %s1138_s9, 2048  ;;  %p1140_p7 = scmp.lt.s32.totalorder %s1463_s8, %s1138_s9 }
  0x7b   : > { %p1135_p10 = pnand %p1133_p6, %p1089_p0  ;;  %p1141_p3 = scmp.lt.s32.totalorder %s1139_s10, %s1132_s14 }
  0x7d   : > { %p1136_p4 = pneg %p1135_p10  ;;  %p1142_p5 = por %p1141_p3, %p1140_p7 }
  0x7f   : > { %p1143_p9 = pnand %p1142_p5, %p1136_p4 }
  0x81   : > { %1146 = shalt.err (!%p1143_p9)
}
  0x82   : > { %s1717_s3 = smov 8   ;;  %s1718_s19 = smov 128  }
  0x83   : > { %979 = dma.hbm_to_vmem [thread:$0]  (!%p1418_p11), %s1459_s29, 1024, %s1463_s8, %s1467_s1, %s1718_s19, %s1718_s19, %s1717_s3  }
  0x84   : > { %259 = sbr.rel (%p1312_p8) target bundleno = 661 (0x295), region = 40  ;;  %s1499_s7 = sand.u32 (!%p1312_p8), 1, %s1217_s21  }
  0x85   : > { %s816_s17 = sshll.u32 (!%p1312_p8), %s1499_s7, 7  ;;  %s262_s16 = scalar_lea.sflag (!%p1312_p8), [#allocation4], %s1499_s7 }
  0x86   : > { %s1505_s15 = scalar_lea.vmem (!%p1312_p8), [#allocation3], %s816_s17  ;;  %p1719_p0 = scmp.ne.s32.totalorder (!%p1312_p8), %s1707_s25, 0 }
  0x8b   : > { %1192 = dma.done.wait (%p1719_p0), %s262_s16, 2048  }
  0x8c   : > { %1194 = vsyncadd (%p1719_p0), %s262_s16, 4294965248  ;;  %s270_s1 = sand.u32 1, %s1293_s0   ;;  %s817_s27 = sshll.u32 %s1499_s7, 6 }
  0x8d   : > { %s271_s29 = scalar_lea.sflag [#allocation7], %s270_s1  ;;  %s1513_s8 = scalar_lea.vmem [#allocation6], %s817_s27 }
  0x8e   : > { %1196 = dma.done.wait (%p1719_p0), %s271_s29, 1024  }
  0x8f   : > { %1198 = vsyncadd (%p1719_p0), %s271_s29, 4294966272  ;;  %p1720_p8 = scmp.eq.s32.totalorder %s1293_s0, 0 }
  0x91   : > { %1200 = dma.done.wait (%p1720_p8), [#allocation7], 4096   ;;  %p1721_p11 = pmov %p1720_p8 }
  0x92   : > { %p1722_p2 = pmov %p1720_p8 }
  0x93   : > { %1202 = vsyncadd (%p1721_p11), [#allocation7], 4294963200 }
  0x94   : > { %1204 = dma.done.wait (%p1722_p2), [#allocation10], 4096   ;;  %p1723_p12 = pmov %p1722_p2 }
  0x95   : > { %v350_v0 = vld [vmem:[#allocation8 + $0x80] sm:$0xff]  ;;  %v351_v1 = vld [vmem:[#allocation8 + $0x88] sm:$0xff]  ;;  %v352_v5 = vld [vmem:[#allocation8 + $0x90] sm:$0xff]  ;;  %s317_s25 = sld [smem:[#allocation2]]  ;;  %s1611_s12 = scalar_lea.vmem [#allocation11], %s816_s17 }
  0x96   : > { %1206 = vsyncadd (%p1723_p12), [#allocation10], 4294963200  ;;  %v334_v2 = vld [vmem:[#allocation8] sm:$0xff]  ;;  %v888_v3 = vpack.c.bf16 %v351_v1, %v350_v0  ;;  %v335_v4 = vld [vmem:[#allocation8 + $0x8] sm:$0xff]  ;;  %s831_s13 = sshll.u32 %s1293_s0, 11  ;;  %s688_s6 = sshll.u32 %s1611_s12, 4  ;;  %s1647_s6 = int_to_ptr.vmem [resolvable:$true] %s688_s6 }
  0x97   : > { %v353_v6 = vld [vmem:[#allocation8 + $0x98] sm:$0xff]  ;;  %v890_v7 = vpack.c.bf16 %v335_v4, %v334_v2  ;;  %v336_v9 = vld [vmem:[#allocation8 + $0x10] sm:$0xff]  ;;  %v354_v11 = vld [vmem:[#allocation8 + $0xa0] sm:$0xff]  ;;  %s1645_s24 = scalar_lea.hbm %s1699_s5, %s831_s13  ;;  %s674_s0 = scalar_lea.sflag [#allocation5], %s1499_s7 }
  0x98   : > { %v892_v8 = vpack.c.bf16 %v353_v6, %v352_v5  ;;  %v337_v10 = vld [vmem:[#allocation8 + $0x18] sm:$0xff]  ;;  %889 = vmatprep.subr.bf16.mxu0 %v888_v3  ;;  %v355_v12 = vld [vmem:[#allocation8 + $0xa8] sm:$0xff]  ;;  %v338_v15 = vld [vmem:[#allocation8 + $0x20] sm:$0xff]  ;;  %s1147_s9 = scalar_lea.vmem %s1647_s6, 2048  ;;  %p1724_p13 = scmp.ne.s32.totalorder %s1713_s30, 0 }
  0x99   : > { %891 = vmatpush3.bf16.msra.mxu0 %v890_v7  ;;  %v894_v13 = vpack.c.bf16 %v337_v10, %v336_v9  ;;  %v896_v14 = vpack.c.bf16 %v355_v12, %v354_v11  ;;  %v339_v16 = vld [vmem:[#allocation8 + $0x28] sm:$0xff]  ;;  %v356_v17 = vld [vmem:[#allocation8 + $0xb0] sm:$0xff]  ;;  %v357_v18 = vld [vmem:[#allocation8 + $0xb8] sm:$0xff]  ;;  %p1148_p1 = scmp.ne.s32.totalorder %s1647_s6, %s1147_s9  ;;  %s1236_s10 = smov [#allocation11]  }
  0x9a   : > { %893 = vmatprep.subr.bf16.mxu0 %v892_v8  ;;  %v898_v19 = vpack.c.bf16 %v339_v16, %v338_v15  ;;  %v900_v20 = vpack.c.bf16 %v357_v18, %v356_v17  ;;  %v340_v21 = vld [vmem:[#allocation8 + $0x30] sm:$0xff]  ;;  %v341_v22 = vld [vmem:[#allocation8 + $0x38] sm:$0xff]  ;;  %v358_v23 = vld [vmem:[#allocation8 + $0xc0] sm:$0xff]  ;;  %s1151_s3 = sshll.u32 %s1236_s10, 4  ;;  %s1152_s3 = int_to_ptr.vmem [resolvable:$false] %s1151_s3 }
  0x9b   : > { %v359_v24 = vld [vmem:[#allocation8 + $0xc8] sm:$0xff]  ;;  %v902_v26 = vpack.c.bf16 %v341_v22, %v340_v21  ;;  %v342_v28 = vld [vmem:[#allocation8 + $0x40] sm:$0xff]  ;;  %v360_v30 = vld [vmem:[#allocation8 + $0xd0] sm:$0xff]  ;;  %p1149_p6 = pnand %p1148_p1, %p1724_p13  ;;  %s1153_s19 = scalar_lea.vmem %s1152_s3, 4096 }
  0x9c   : > { %v1528_v25 = vld [vmem:[%s1505_s15 + $0x8] sm:$0xff]  ;;  %v904_v27 = vpack.c.bf16 %v359_v24, %v358_v23  ;;  %v361_v31 = vld [vmem:[#allocation8 + $0xd8] sm:$0xff]  ;;  %v344_v32 = vld [vmem:[#allocation8 + $0x50] sm:$0xff]  ;;  %p1154_p4 = scmp.lt.s32.totalorder %s1647_s6, %s1152_s3  ;;  %p1155_p7 = scmp.lt.s32.totalorder %s1153_s19, %s1147_s9 }
  0x9d   : > { %895 = vmatpush3.bf16.msra.mxu0 %v894_v13  ;;  %430 = vmatprep.mubr.f32.mxu0 %v1528_v25  ;;  %v343_v29 = vld [vmem:[#allocation8 + $0x48] sm:$0xff]  ;;  %v345_v33 = vld [vmem:[#allocation8 + $0x58] sm:$0xff]  ;;  %v362_v35 = vld [vmem:[#allocation8 + $0xe0] sm:$0xff]  ;;  %v908_v40 = vpack.c.bf16 %v361_v31, %v360_v30  ;;  %p1150_p10 = pneg %p1149_p6 }
  0x9e   : > { %897 = vmatprep.subr.bf16.mxu0 %v896_v14  ;;  %v906_v34 = vpack.c.bf16 %v343_v29, %v342_v28  ;;  %v363_v36 = vld [vmem:[#allocation8 + $0xe8] sm:$0xff]  ;;  %v499_v38 = vld [vmem:[#allocation9 + $0x18] sm:$0xff]  ;;  %v496_v39 = vld [vmem:[#allocation9] sm:$0xff]  ;;  %v910_v51 = vpack.c.bf16 %v345_v33, %v344_v32  ;;  %p1156_p3 = por %p1155_p7, %p1154_p4 }
  0x9f   : > { %v497_v37 = vld [vmem:[#allocation9 + $0x8] sm:$0xff]  ;;  %v498_v42 = vld [vmem:[#allocation9 + $0x10] sm:$0xff]  ;;  %v503_v44 = vld [vmem:[#allocation9 + $0x38] sm:$0xff]  ;;  %v912_v55 = vpack.c.bf16 %v363_v36, %v362_v35 }
  0xa0   : > { %v920_v41 = vpack.c.bf16 %v499_v38, %v497_v37  ;;  %v501_v43 = vld [vmem:[#allocation9 + $0x28] sm:$0xff]  ;;  %v922_v45 = vpack.c.bf16 %v498_v42, %v496_v39  ;;  %v500_v47 = vld [vmem:[#allocation9 + $0x20] sm:$0xff]  ;;  %v502_v48 = vld [vmem:[#allocation9 + $0x30] sm:$0xff]  ;;  %p1157_p5 = pnand %p1156_p3, %p1150_p10 }
  0xa1   : > { %899 = vmatpush3.bf16.msra.mxu0 %v898_v19  ;;  %v924_v46 = vpack.c.bf16 %v503_v44, %v501_v43  ;;  %v505_v49 = vld [vmem:[#allocation9 + $0x48] sm:$0xff]  ;;  %v507_v50 = vld [vmem:[#allocation9 + $0x58] sm:$0xff]  ;;  %v346_v52 = vld [vmem:[#allocation8 + $0x60] sm:$0xff]  ;;  %v926_v54 = vpack.c.bf16 %v502_v48, %v500_v47 }
  0xa2   : > { %901 = vmatprep.subr.bf16.mxu0 %v900_v20  ;;  %921 = vmatprep.subr.bf16.mxu1 %v920_v41  ;;  %v347_v53 = vld [vmem:[#allocation8 + $0x68] sm:$0xff]  ;;  %v364_v56 = vld [vmem:[#allocation8 + $0xf0] sm:$0xff]  ;;  %v928_v57 = vpack.c.bf16 %v507_v50, %v505_v49  ;;  %v504_v58 = vld [vmem:[#allocation9 + $0x40] sm:$0xff]  ;;  %v1235_v49 = vmov 0.0  }
  0xa3   : > { %923 = vmatpush1.bf16.msra.mxu1 %v922_v45  ;;  %v506_v59 = vld [vmem:[#allocation9 + $0x50] sm:$0xff]  ;;  %v365_v60 = vld [vmem:[#allocation8 + $0xf8] sm:$0xff]  ;;  %v509_v61 = vld [vmem:[#allocation9 + $0x68] sm:$0xff]  ;;  %v914_v63 = vpack.c.bf16 %v347_v53, %v346_v52  ;;  %592 = vmatprep.mubr.f32.mxu1 %v1235_v49 }
  0xa4   : > { %925 = vmatprep.subr.bf16.mxu1 %v924_v46  ;;  %v511_v62 = vld [vmem:[#allocation9 + $0x78] sm:$0xff]  ;;  %v348_v0 = vld [vmem:[#allocation8 + $0x70] sm:$0xff]  ;;  %v930_v1 = vpack.c.bf16 %v506_v59, %v504_v58  ;;  %v916_v2 = vpack.c.bf16 %v365_v60, %v364_v56  ;;  %v508_v5 = vld [vmem:[#allocation9 + $0x60] sm:$0xff] }
  0xa5   : > { %903 = vmatpush3.bf16.msra.mxu0 %v902_v26  ;;  %v349_v3 = vld [vmem:[#allocation8 + $0x78] sm:$0xff]  ;;  %v932_v4 = vpack.c.bf16 %v511_v62, %v509_v61  ;;  %v510_v6 = vld [vmem:[#allocation9 + $0x70] sm:$0xff]  ;;  %v513_v7 = vld [vmem:[#allocation9 + $0x88] sm:$0xff] }
  0xa6   : > { %905 = vmatprep.subr.bf16.mxu0 %v904_v27  ;;  %v515_v8 = vld [vmem:[#allocation9 + $0x98] sm:$0xff]  ;;  %v918_v9 = vpack.c.bf16 %v349_v3, %v348_v0  ;;  %v934_v10 = vpack.c.bf16 %v510_v6, %v508_v5  ;;  %v512_v12 = vld [vmem:[#allocation9 + $0x80] sm:$0xff]  ;;  %v514_v13 = vld [vmem:[#allocation9 + $0x90] sm:$0xff] }
  0xa7   : > { %927 = vmatpush1.bf16.msra.mxu1 %v926_v54  ;;  %v936_v11 = vpack.c.bf16 %v515_v8, %v513_v7  ;;  %v517_v14 = vld [vmem:[#allocation9 + $0xa8] sm:$0xff]  ;;  %v519_v15 = vld [vmem:[#allocation9 + $0xb8] sm:$0xff]  ;;  %v1532_v16 = vld [vmem:[%s1505_s15] sm:$0xff]  ;;  %v938_v17 = vpack.c.bf16 %v514_v13, %v512_v12  ;;  %v487_v54 = vstv %s317_s25 }
  0xa8   : > { %929 = vmatprep.subr.bf16.mxu1 %v928_v57  ;;  %v1535_v18 = vld [vmem:[%s1505_s15 + $0x18] sm:$0xff]  ;;  %v940_v19 = vpack.c.bf16 %v519_v15, %v517_v14  ;;  %v516_v20 = vld [vmem:[#allocation9 + $0xa0] sm:$0xff]  ;;  %v518_v21 = vld [vmem:[#allocation9 + $0xb0] sm:$0xff] }
  0xa9   : > { %907 = vmatpush3.bf16.msra.mxu0 %v906_v34  ;;  %v1540_v22 = vld [vmem:[%s1505_s15 + $0x10] sm:$0xff]  ;;  %v942_v23 = vpack.c.bf16 %v518_v21, %v516_v20  ;;  %v1543_v24 = vld [vmem:[%s1505_s15 + $0x28] sm:$0xff]  ;;  %v1548_v26 = vld [vmem:[%s1505_s15 + $0x20] sm:$0xff] }
  0xaa   : > { %909 = vmatprep.subr.bf16.mxu0 %v908_v40  ;;  %v1551_v27 = vld [vmem:[%s1505_s15 + $0x38] sm:$0xff]  ;;  %v1556_v28 = vld [vmem:[%s1505_s15 + $0x30] sm:$0xff]  ;;  %v1559_v29 = vld [vmem:[%s1505_s15 + $0x48] sm:$0xff] }
  0xab   : > { %931 = vmatpush1.bf16.msra.mxu1 %v930_v1  ;;  %v1564_v30 = vld [vmem:[%s1505_s15 + $0x40] sm:$0xff]  ;;  %v1567_v31 = vld [vmem:[%s1505_s15 + $0x58] sm:$0xff]  ;;  %v1572_v32 = vld [vmem:[%s1505_s15 + $0x50] sm:$0xff] }
  0xac   : > { %933 = vmatprep.subr.bf16.mxu1 %v932_v4  ;;  %v1575_v33 = vld [vmem:[%s1505_s15 + $0x68] sm:$0xff]  ;;  %v1580_v34 = vld [vmem:[%s1505_s15 + $0x60] sm:$0xff]  ;;  %v1583_v35 = vld [vmem:[%s1505_s15 + $0x78] sm:$0xff] }
  0xad   : > { %911 = vmatpush3.bf16.msra.mxu0 %v910_v51  ;;  %v1588_v36 = vld [vmem:[%s1505_s15 + $0x70] sm:$0xff]  ;;  %v521_v37 = vld [vmem:[#allocation9 + $0xc8] sm:$0xff]  ;;  %v523_v38 = vld [vmem:[#allocation9 + $0xd8] sm:$0xff] }
  0xae   : > { %913 = vmatprep.subr.bf16.mxu0 %v912_v55  ;;  %v944_v39 = vpack.c.bf16 %v523_v38, %v521_v37  ;;  %v520_v40 = vld [vmem:[#allocation9 + $0xc0] sm:$0xff]  ;;  %v522_v41 = vld [vmem:[#allocation9 + $0xd0] sm:$0xff]  ;;  %v525_v43 = vld [vmem:[#allocation9 + $0xe8] sm:$0xff] }
  0xaf   : > { %935 = vmatpush1.bf16.msra.mxu1 %v934_v10  ;;  %v946_v42 = vpack.c.bf16 %v522_v41, %v520_v40  ;;  %v527_v44 = vld [vmem:[#allocation9 + $0xf8] sm:$0xff]  ;;  %v524_v46 = vld [vmem:[#allocation9 + $0xe0] sm:$0xff]  ;;  %v526_v47 = vld [vmem:[#allocation9 + $0xf0] sm:$0xff] }
  0xb0   : > { %937 = vmatprep.subr.bf16.mxu1 %v936_v11  ;;  %v948_v45 = vpack.c.bf16 %v527_v44, %v525_v43  ;;  %v950_v48 = vpack.c.bf16 %v526_v47, %v524_v46  ;;  %v471_v52 = vld [vmem:[%s1513_s8] sm:$0xff]  ;;  %v472_v58 = vld [vmem:[%s1513_s8 + $0x8] sm:$0xff]  ;;  %v473_v0 = vld [vmem:[%s1513_s8 + $0x10] sm:$0xff] }
  0xb1   : > { %915 = vmatpush3.bf16.msra.mxu0 %v914_v63  ;;  %v474_v6 = vld [vmem:[%s1513_s8 + $0x18] sm:$0xff]  ;;  %v475_v12 = vld [vmem:[%s1513_s8 + $0x20] sm:$0xff]  ;;  %v476_v20 = vld [vmem:[%s1513_s8 + $0x28] sm:$0xff] }
  0xb2   : > { %917 = vmatprep.subr.bf16.mxu0 %v916_v2  ;;  %v477_v40 = vld [vmem:[%s1513_s8 + $0x30] sm:$0xff]  ;;  %v478_v46 = vld [vmem:[%s1513_s8 + $0x38] sm:$0xff] }
  0xb3   : > { %939 = vmatpush1.bf16.msra.mxu1 %v938_v17 }
  0xb4   : > { %941 = vmatprep.subr.bf16.mxu1 %v940_v19 }
  0xb5   : > { %919 = vmatpush3.bf16.msra.mxu0 %v918_v9 }
  0xb7   : > { %943 = vmatpush1.bf16.msra.mxu1 %v942_v23 }
  0xb8   : > { %431 = vmatmul.mubr.f32.vlgmr.msra.gmra.mrb[0].mxu0 %v1532_v16  ;;  %945 = vmatprep.subr.bf16.mxu1 %v944_v39 }
  0xb9   : > { %435 = vmatprep.mubr.f32.mxu0 %v1535_v18 }
  0xbb   : > { %947 = vmatpush1.bf16.msra.mxu1 %v946_v42 }
  0xbc   : > { %436 = vmatmul.mubr.f32.gmra.mrb[2].mxu0 %v1540_v22  ;;  %949 = vmatprep.subr.bf16.mxu1 %v948_v45 }
  0xbd   : > { %440 = vmatprep.mubr.f32.mxu0 %v1543_v24 }
  0xbf   : > { %951 = vmatpush1.bf16.msra.mxu1 %v950_v48 }
  0xc0   : > { %441 = vmatmul.mubr.f32.gmra.mrb[4].mxu0 %v1548_v26 }
  0xc1   : > { %445 = vmatprep.mubr.f32.mxu0 %v1551_v27 }
  0xc4   : > { %446 = vmatmul.mubr.f32.gmra.mrb[6].mxu0 %v1556_v28 }
  0xc5   : > { %450 = vmatprep.mubr.f32.mxu0 %v1559_v29 }
  0xc8   : > { %451 = vmatmul.mubr.f32.gmra.mrb[8].mxu0 %v1564_v30 }
  0xc9   : > { %455 = vmatprep.mubr.f32.mxu0 %v1567_v31 }
  0xcc   : > { %456 = vmatmul.mubr.f32.gmra.mrb[10].mxu0 %v1572_v32 }
  0xcd   : > { %460 = vmatprep.mubr.f32.mxu0 %v1575_v33 }
  0xd0   : > { %461 = vmatmul.mubr.f32.gmra.mrb[12].mxu0 %v1580_v34 }
  0xd1   : > { %465 = vmatprep.mubr.f32.mxu0 %v1583_v35 }
  0xd4   : > { %466 = vmatmul.mubr.f32.gmra.mrb[14].mxu0 %v1588_v36 }
 0x18b   : > { %v864_v50 = vpop.f32.mrb[0].mxu0 }
 0x18c   : > { %v865_v51 = vpop.f32.mrb[1].mxu0 }
 0x18d   : > { %v866_v53 = vadd.f32 %v865_v51, %v864_v50 }
 0x18f   : > { %v479_v55 = vsub.f32 %v866_v53, %v471_v52  ;;  %v867_v56 = vpop.f32.mrb[2].mxu0 }
 0x190   : > { %v868_v57 = vpop.f32.mrb[3].mxu0 }
 0x191   : > { %v869_v59 = vadd.f32 %v868_v57, %v867_v56  ;;  %v488_v60 = vmul.f32 %v487_v54, %v479_v55 }
 0x193   : > { %v480_v61 = vsub.f32 %v869_v59, %v472_v58  ;;  %v870_v62 = vpop.f32.mrb[4].mxu0  ;;  %593 = vmatmul.mubr.f32.vlgmr.msra.gmra.mrb[0].mxu1 %v488_v60 }
 0x194   : > { %v871_v63 = vpop.f32.mrb[5].mxu0  ;;  %598 = vmatprep.mubr.f32.mxu1 %v1235_v49 }
 0x195   : > { %v872_v1 = vadd.f32 %v871_v63, %v870_v62  ;;  %v489_v2 = vmul.f32 %v487_v54, %v480_v61 }
 0x197   : > { %v481_v3 = vsub.f32 %v872_v1, %v473_v0  ;;  %v873_v4 = vpop.f32.mrb[6].mxu0  ;;  %599 = vmatmul.mubr.f32.gmra.mrb[2].mxu1 %v489_v2 }
 0x198   : > { %v874_v5 = vpop.f32.mrb[7].mxu0  ;;  %604 = vmatprep.mubr.f32.mxu1 %v1235_v49 }
 0x199   : > { %v875_v7 = vadd.f32 %v874_v5, %v873_v4  ;;  %v490_v8 = vmul.f32 %v487_v54, %v481_v3 }
 0x19b   : > { %v482_v9 = vsub.f32 %v875_v7, %v474_v6  ;;  %v876_v10 = vpop.f32.mrb[8].mxu0  ;;  %605 = vmatmul.mubr.f32.gmra.mrb[4].mxu1 %v490_v8 }
 0x19c   : > { %v877_v11 = vpop.f32.mrb[9].mxu0  ;;  %610 = vmatprep.mubr.f32.mxu1 %v1235_v49 }
 0x19d   : > { %v878_v13 = vadd.f32 %v877_v11, %v876_v10  ;;  %v491_v14 = vmul.f32 %v487_v54, %v482_v9 }
 0x19f   : > { %v483_v15 = vsub.f32 %v878_v13, %v475_v12  ;;  %v879_v17 = vpop.f32.mrb[10].mxu0  ;;  %611 = vmatmul.mubr.f32.gmra.mrb[6].mxu1 %v491_v14 }
 0x1a0   : > { %v880_v19 = vpop.f32.mrb[11].mxu0  ;;  %616 = vmatprep.mubr.f32.mxu1 %v1235_v49 }
 0x1a1   : > { %v881_v21 = vadd.f32 %v880_v19, %v879_v17  ;;  %v492_v23 = vmul.f32 %v487_v54, %v483_v15 }
 0x1a3   : > { %v484_v37 = vsub.f32 %v881_v21, %v476_v20  ;;  %v882_v38 = vpop.f32.mrb[12].mxu0  ;;  %617 = vmatmul.mubr.f32.gmra.mrb[8].mxu1 %v492_v23 }
 0x1a4   : > { %v883_v39 = vpop.f32.mrb[13].mxu0  ;;  %622 = vmatprep.mubr.f32.mxu1 %v1235_v49 }
 0x1a5   : > { %v884_v41 = vadd.f32 %v883_v39, %v882_v38  ;;  %v493_v42 = vmul.f32 %v487_v54, %v484_v37 }
 0x1a7   : > { %v485_v43 = vsub.f32 %v884_v41, %v477_v40  ;;  %v885_v44 = vpop.f32.mrb[14].mxu0  ;;  %623 = vmatmul.mubr.f32.gmra.mrb[10].mxu1 %v493_v42 }
 0x1a8   : > { %v886_v45 = vpop.f32.mrb[15].mxu0  ;;  %628 = vmatprep.mubr.f32.mxu1 %v1235_v49 }
 0x1a9   : > { %v887_v47 = vadd.f32 %v886_v45, %v885_v44  ;;  %v494_v48 = vmul.f32 %v487_v54, %v485_v43 }
 0x1ab   : > { %v486_v50 = vsub.f32 %v887_v47, %v478_v46  ;;  %629 = vmatmul.mubr.f32.gmra.mrb[12].mxu1 %v494_v48 }
 0x1ac   : > { %634 = vmatprep.mubr.f32.mxu1 %v1235_v49 }
 0x1ad   : > { %v495_v51 = vmul.f32 %v487_v54, %v486_v50 }
 0x1af   : > { %635 = vmatmul.mubr.f32.gmra.mrb[14].mxu1 %v495_v51 }
 0x266   : > { %v594_v52 = vpop.f32.mrb[0].mxu1 }
 0x267   : > { %v641_v53 = vsub.f32 %v1532_v16, %v594_v52  ;;  %v596_v55 = vpop.f32.mrb[1].mxu1 }
 0x268   : > { %v642_v56 = vsub.f32 %v1528_v25, %v596_v55 }
 0x269   : > { %657 = vst [vmem:[%s1611_s12] sm:$0xff] %v641_v53 }
 0x26a   : > { %658 = vst [vmem:[%s1611_s12 + $0x8] sm:$0xff] %v642_v56  ;;  %v600_v49 = vpop.f32.mrb[2].mxu1 }
 0x26b   : > { %v643_v54 = vsub.f32 %v1540_v22, %v600_v49  ;;  %v602_v16 = vpop.f32.mrb[3].mxu1 }
 0x26c   : > { %v644_v57 = vsub.f32 %v1535_v18, %v602_v16 }
 0x26d   : > { %659 = vst [vmem:[%s1611_s12 + $0x10] sm:$0xff] %v643_v54 }
 0x26e   : > { %660 = vst [vmem:[%s1611_s12 + $0x18] sm:$0xff] %v644_v57  ;;  %v606_v25 = vpop.f32.mrb[4].mxu1 }
 0x26f   : > { %v645_v58 = vsub.f32 %v1548_v26, %v606_v25  ;;  %v608_v59 = vpop.f32.mrb[5].mxu1 }
 0x270   : > { %v646_v60 = vsub.f32 %v1543_v24, %v608_v59 }
 0x271   : > { %661 = vst [vmem:[%s1611_s12 + $0x20] sm:$0xff] %v645_v58 }
 0x272   : > { %662 = vst [vmem:[%s1611_s12 + $0x28] sm:$0xff] %v646_v60  ;;  %v612_v61 = vpop.f32.mrb[6].mxu1 }
 0x273   : > { %v647_v22 = vsub.f32 %v1556_v28, %v612_v61  ;;  %v614_v62 = vpop.f32.mrb[7].mxu1 }
 0x274   : > { %v648_v18 = vsub.f32 %v1551_v27, %v614_v62 }
 0x275   : > { %663 = vst [vmem:[%s1611_s12 + $0x30] sm:$0xff] %v647_v22 }
 0x276   : > { %664 = vst [vmem:[%s1611_s12 + $0x38] sm:$0xff] %v648_v18  ;;  %v618_v63 = vpop.f32.mrb[8].mxu1 }
 0x277   : > { %v649_v26 = vsub.f32 %v1564_v30, %v618_v63  ;;  %v620_v0 = vpop.f32.mrb[9].mxu1 }
 0x278   : > { %v650_v24 = vsub.f32 %v1559_v29, %v620_v0 }
 0x279   : > { %665 = vst [vmem:[%s1611_s12 + $0x40] sm:$0xff] %v649_v26 }
 0x27a   : > { %666 = vst [vmem:[%s1611_s12 + $0x48] sm:$0xff] %v650_v24  ;;  %v624_v1 = vpop.f32.mrb[10].mxu1 }
 0x27b   : > { %v651_v28 = vsub.f32 %v1572_v32, %v624_v1  ;;  %v626_v2 = vpop.f32.mrb[11].mxu1 }
 0x27c   : > { %v652_v27 = vsub.f32 %v1567_v31, %v626_v2 }
 0x27d   : > { %667 = vst [vmem:[%s1611_s12 + $0x50] sm:$0xff] %v651_v28 }
 0x27e   : > { %668 = vst [vmem:[%s1611_s12 + $0x58] sm:$0xff] %v652_v27  ;;  %v630_v3 = vpop.f32.mrb[12].mxu1 }
 0x27f   : > { %v653_v30 = vsub.f32 %v1580_v34, %v630_v3  ;;  %v632_v4 = vpop.f32.mrb[13].mxu1 }
 0x280   : > { %v654_v29 = vsub.f32 %v1575_v33, %v632_v4 }
 0x281   : > { %669 = vst [vmem:[%s1611_s12 + $0x60] sm:$0xff] %v653_v30 }
 0x282   : > { %670 = vst [vmem:[%s1611_s12 + $0x68] sm:$0xff] %v654_v29  ;;  %v636_v32 = vpop.f32.mrb[14].mxu1 }
 0x283   : > { %v655_v5 = vsub.f32 %v1588_v36, %v636_v32  ;;  %v638_v31 = vpop.f32.mrb[15].mxu1 }
 0x284   : > { %v656_v33 = vsub.f32 %v1583_v35, %v638_v31 }
 0x285   : > { %671 = vst [vmem:[%s1611_s12 + $0x70] sm:$0xff] %v655_v5 }
 0x286   : > { %672 = vst [vmem:[%s1611_s12 + $0x78] sm:$0xff] %v656_v33 }
 0x287   : > { %1160 = shalt.err (!%p1157_p5)
}
 0x288   : > { %s1161_s17 = scalar_lea.hbm %s1645_s24, 2048  ;;  %s1165_s1 = scalar_lea.hbm %s1699_s5, 4096 }
 0x289   : > { %p1162_p9 = scmp.ne.s32.totalorder %s1645_s24, %s1161_s17  ;;  %p1166_p11 = scmp.lt.u32.totalorder %s1645_s24, %s1699_s5 }
 0x28a   : > { %p1167_p2 = scmp.lt.u32.totalorder %s1165_s1, %s1161_s17  ;;  %p1169_p1 = scmp.lt.u32.totalorder %s1161_s17, %s1645_s24 }
 0x28b   : > { %p1163_p0 = pnand %p1162_p9, %p1724_p13 }
 0x28c   : > { %p1168_p12 = por %p1167_p2, %p1166_p11 }
 0x28d   : > { %p1164_p8 = pneg %p1163_p0 }
 0x28e   : > { %p1170_p6 = por %p1169_p1, %p1168_p12 }
 0x290   : > { %p1171_p10 = pnand %p1170_p6, %p1164_p8 }
 0x292   : > { %1174 = shalt.err (!%p1171_p10)
}
 0x293   : > { %s1237_s8 = smov 256   ;;  %s1238_s25 = smov 16  }
 0x294   : > { %964 = dma.vmem_to_hbm [thread:$0]  (%p1724_p13), %s1647_s6, 2048, %s1645_s24, %s674_s0, %s1237_s8, %s1237_s8, %s1238_s25  }
 0x295 PF: > { %s703_s12 = sand.u32 1, %s1213_s20   ;;  %p1725_p4 = scmp.ne.s32.totalorder %s1708_s26, 0 }
 0x296   : > { %p1726_p7 = scmp.ge.s32.totalorder %s1225_s23, 2  ;;  %s704_s13 = scalar_lea.sflag [#allocation5], %s703_s12 }
 0x298   : > { %p981_p3 = pnand %p1726_p7, %p1725_p4 }
 0x29a   : > { %1208 = dma.done.wait (!%p981_p3), %s704_s13, 2048  }
 0x29b   : > { %1210 = vsyncadd (!%p981_p3), %s704_s13, 4294965248  ;;  %p23_p5 = scmp.ge.s32.totalorder %s1388_s18, 4   ;;  %s1727_s20 = smov %s1217_s21 }
 0x29c   : > { %s1728_s21 = smov %s1221_s22  ;;  %s1729_s22 = smov %s1397_s28 }
 0x29d   : > { %s1730_s23 = smov %s1388_s18  ;;  %25 = sbr.rel (!%p23_p5) target bundleno = 12 (0xc), region = 106 }
 0x2a4   :  { %709 = vsyncpa [#allocation4], 1 }
 0x2a5   :  { %711 = vsyncpa [#allocation4 + $0x1], 1 }
 0x2a6   :  { %712 = vsyncpa [#allocation7], 1 }
 0x2a7   :  { %714 = vsyncpa [#allocation7 + $0x1], 1 }
 0x2a8   :  { %715 = vsyncpa [#allocation10], 1 }
 0x2a9   :  { %716 = vsyncpa [#allocation5], 1 }
 0x2aa   :  { %718 = vsyncpa [#allocation5 + $0x1], 1 }

</bundles_post_ra>
